<compile_context>
chip_gen: v7x
topology: tpu7x:2x2x1
jax: 0.10.0
libtpu: 0.0.40
codegen_flags: <defaults>
</compile_context>

<pallas_src>
import numpy as np
import jax
import jax.numpy as jnp
from jax import lax
from jax.experimental import pallas as pl
from jax.experimental.pallas import tpu as pltpu


def _round_up(x, m):
    return (x + m - 1) // m * m


def _vmem_capacity_bytes():
    """Per-generation VMEM capacity (falls back to the v7x per-core 64 MiB)."""
    try:
        info = pltpu.get_tpu_info()
        for name in ("vmem_capacity_bytes", "vmem_bytes", "vmem_size_bytes"):
            v = getattr(info, name, None)
            if v:
                return int(v)
    except Exception:
        pass
    return 64 * 1024 * 1024


# --------------------------------------------------------------------------
# Pallas kernel: fused mask projection + focal/BCE + dice partial sums
# --------------------------------------------------------------------------
def _make_semantic_mask_loss_kernel(alpha, gamma, focal_label, tile_l):
    n_chunks = tile_l // 128

    def kernel(q_ref, feat_ref, tgt_ref, lmask_ref,
               loss_ref, inter_ref, psum_ref, tsum_ref):
        lt = pl.program_id(3)                        # lane-tile (reduction) axis

        @pl.when(lt == 0)
        def _():
            loss_ref[...] = jnp.zeros_like(loss_ref)
            inter_ref[...] = jnp.zeros_like(inter_ref)
            psum_ref[...] = jnp.zeros_like(psum_ref)
            tsum_ref[...] = jnp.zeros_like(tsum_ref)

        q = q_ref[0]                                 # (TR, C)  bf16 matched coeffs
        f = feat_ref[0]                              # (C, TL)  bf16 features
        # Fused projection (src_mask logits) on the MXU: bf16 inputs, f32 accumulate.
        x = jnp.dot(q, f, preferred_element_type=jnp.float32)   # (TR, TL) f32
        t = tgt_ref[0].astype(jnp.float32)           # (TR, TL) binary targets
        lm = lmask_ref[...]                          # (1, TL)  valid-lane mask

        # One EUP exp shared by the sigmoid and the stable-BCE softplus.
        e = jnp.exp(-jnp.abs(x))
        ce = jnp.maximum(x, 0.0) - x * t + jnp.log1p(e)
        inv = pl.reciprocal(1.0 + e, approx=True)
        p = jnp.where(x >= 0.0, 1.0, e) * inv        # sigmoid(x)

        if focal_label:
            p_t = p * t + (1.0 - p) * (1.0 - t)
            mod = 1.0 - p_t
            mod = mod * mod if gamma == 2.0 else mod ** gamma
            loss = ce * mod
            if alpha >= 0:
                loss = (alpha * t + (1.0 - alpha) * (1.0 - t)) * loss
        else:
            loss = ce

        # Padded lanes: t is already 0 there, so inter / tsum need no mask;
        # padded rows are zeroed by the row mask in the wrapper epilogue.
        loss = loss * lm
        pv = p * lm
        it = p * t

        # Lane-wide partial sums: pure VPU adds over aligned 128-lane chunks;
        # the cross-lane reduction happens once, outside the kernel.
        def csum(v):
            acc = v[:, 0:128]
            for c in range(1, n_chunks):
                acc = acc + v[:, c * 128:(c + 1) * 128]
            return acc

        loss_ref[0, 0] += csum(loss)
        inter_ref[0, 0] += csum(it)
        psum_ref[0, 0] += csum(pv)
        tsum_ref[0, 0] += csum(t)

    return kernel


def semantic_mask_loss_pallas(q_packed, feat_flat, tgt_packed, lane_mask, *,
                              tile_r, tile_l, n_splits, alpha, gamma, focal_label,
                              vmem_limit_bytes):
    """q_packed: [B,Qp,Cp] bf16; feat_flat: [B,Cp,Lp] bf16; tgt_packed: [B,Qp,Lp] int8;
    lane_mask: [1,Lp] f32.  Returns four (n_splits,B,Qp,128) f32 partial-sum slabs."""
    B, Qp, Cp = q_packed.shape
    _, _, Lp = feat_flat.shape
    assert Qp % tile_r == 0 and Lp % tile_l == 0
    n_lane_tiles = Lp // tile_l
    assert n_lane_tiles % n_splits == 0
    lps = n_lane_tiles // n_splits        # lane tiles handled per parallel split

    grid = (n_splits, B, Qp // tile_r, lps)
    kernel = _make_semantic_mask_loss_kernel(alpha, gamma, focal_label, tile_l)

    acc_shape = jax.ShapeDtypeStruct((n_splits, B, Qp, 128), jnp.float32)
    acc_spec = pl.BlockSpec((1, 1, tile_r, 128), lambda s, b, r, l: (s, b, r, 0))

    return pl.pallas_call(
        kernel,
        out_shape=(acc_shape, acc_shape, acc_shape, acc_shape),
        grid_spec=pltpu.PrefetchScalarGridSpec(
            num_scalar_prefetch=0,
            grid=grid,
            in_specs=[
                pl.BlockSpec((1, tile_r, Cp), lambda s, b, r, l: (b, r, 0)),
                pl.BlockSpec((1, Cp, tile_l), lambda s, b, r, l: (b, 0, s * lps + l)),
                pl.BlockSpec((1, tile_r, tile_l), lambda s, b, r, l: (b, r, s * lps + l)),
                pl.BlockSpec((1, tile_l), lambda s, b, r, l: (0, s * lps + l)),
            ],
            out_specs=[acc_spec, acc_spec, acc_spec, acc_spec],
        ),
        compiler_params=pltpu.CompilerParams(
            dimension_semantics=("parallel", "parallel", "parallel", "arbitrary"),
            vmem_limit_bytes=vmem_limit_bytes),
    )(q_packed, feat_flat, tgt_packed, lane_mask)


# --------------------------------------------------------------------------
# Host-side glue reproducing the PyTorch module's bookkeeping
# --------------------------------------------------------------------------
def concat_and_pad_masks(mask_list):
    """Zero-pad each [n_i, H_i, W_i] mask set to the batch-max (H, W), concat on dim 0."""
    max_h = max(m.shape[1] for m in mask_list)
    max_w = max(m.shape[2] for m in mask_list)
    padded = []
    for m in mask_list:
        m = np.asarray(m, dtype=np.float32)
        n, h, w = m.shape
        out = np.zeros((n, max_h, max_w), dtype=np.float32)
        out[:, :h, :w] = m
        padded.append(out)
    return np.concatenate(padded, axis=0), None


def nearest_resize_np(masks, out_h, out_w):
    """PyTorch F.interpolate(mode='nearest'): src_idx = floor(dst_idx * in / out)."""
    n, h, w = masks.shape
    ri = (np.arange(out_h) * h) // out_h
    ci = (np.arange(out_w) * w) // out_w
    return masks[:, ri][:, :, ci]


def semantic_mask_loss_forward(output, feat, targets, indices, num_boxes, *,
                               focal_label=True, alpha=0.25, gamma=2.0):
    """output: [B, Q, C] query coeffs; feat: [B, C, H, W] mask features."""
    output = jnp.asarray(output, jnp.float32)
    feat = jnp.asarray(feat, jnp.float32)
    B, Q, C = output.shape
    _, Cf, H, W = feat.shape
    assert C == Cf
    L = H * W

    # TODO(synk): the original's `+ output[0][0].sum() * 0` is a gradient-connectivity
    # no-op (forward identity) and this script only implements the forward pass — a
    # custom_vjp backward kernel would be needed to train through pallas_call.

    n_rows = [len(np.asarray(src)) for (src, _) in indices]
    max_n = max(max(n_rows), 1)

    # ---- tiling parameters ---------------------------------------------------
    if max_n <= 128:
        Q_pad = _round_up(max_n, 32)        # 32: int8 sublane tile for targets
        tile_r = Q_pad
    else:
        Q_pad = _round_up(max_n, 128)       # wide M: feat streamed once per row tile
        tile_r = 128
    C_pad = _round_up(C, 16)                # bf16 sublane only — no 128 padding
    L128 = _round_up(L, 128)

    cap = _vmem_capacity_bytes()
    vmem_limit = int(cap * 0.75)
    block_budget = int(cap * 0.45)

    tile_l = min(L128, 8192)                # large lane-dense spatial tiles

    def _step_bytes(tl):                    # double-buffered per-step footprint
        per = (C_pad * tl * 2               # feat block (bf16)
               + tile_r * tl * 1            # target block (int8)
               + tile_r * C_pad * 2         # coeff block (bf16)
               + tl * 4                     # lane mask (f32)
               + 4 * tile_r * 128 * 4)      # four f32 accumulators
        return per * 2

    while tile_l > 512 and _step_bytes(tile_l) > block_budget:
        tile_l //= 2
    L_pad = _round_up(L128, tile_l)
    n_lane_tiles = L_pad // tile_l

    # Guarantee >= 2 "parallel" grid tiles so both v7x TensorCores are used.
    n_splits = 1
    if B * (Q_pad // tile_r) < 2 and n_lane_tiles >= 2:
        n_splits = 2
        if n_lane_tiles % 2:
            L_pad += tile_l
            n_lane_tiles += 1

    # ---- pack operands in narrow dtypes (bf16 coeffs/feat, int8 targets) -----
    q_packed = jnp.zeros((B, Q_pad, C_pad), jnp.bfloat16)
    for i, (src, _) in enumerate(indices):
        src = np.asarray(src)
        if src.size:
            q_packed = q_packed.at[i, :src.size, :C].set(
                output[i, src].astype(jnp.bfloat16))

    feat_flat = jnp.zeros((B, C_pad, L_pad), jnp.bfloat16)
    feat_flat = feat_flat.at[:, :C, :L].set(
        feat.reshape(B, C, L).astype(jnp.bfloat16))

    # Matched target masks: pad low-res on host (tiny), nearest-resize on device so
    # only the low-resolution masks cross host->device.
    gathered = [np.asarray(t["masks"], dtype=np.float32)[np.asarray(tgt)]
                for t, (_, tgt) in zip(targets, indices)]
    tgt_low, _ = concat_and_pad_masks(gathered)                 # (N, h, w) host
    tgt_low = jnp.asarray(tgt_low.astype(np.int8))              # binary {0,1} labels
    _, h_lo, w_lo = tgt_low.shape
    ri = (jnp.arange(H) * h_lo) // H                            # F.interpolate 'nearest'
    ci = (jnp.arange(W) * w_lo) // W
    tgt_hi = tgt_low[:, ri][:, :, ci].reshape(-1, L)            # (N, L) int8, on device

    tgt_packed = jnp.zeros((B, Q_pad, L_pad), jnp.int8)
    off = 0
    for i in range(B):
        n = n_rows[i]
        if n:
            tgt_packed = tgt_packed.at[i, :n, :L].set(tgt_hi[off:off + n])
        off += n

    lane_mask = jnp.zeros((1, L_pad), jnp.float32).at[:, :L].set(1.0)
    row_mask_np = np.zeros((B, Q_pad), np.float32)
    for i in range(B):
        row_mask_np[i, :n_rows[i]] = 1.0
    row_mask = jnp.asarray(row_mask_np)

    loss_p, inter_p, psum_p, tsum_p = semantic_mask_loss_pallas(
        q_packed, feat_flat, tgt_packed, lane_mask,
        tile_r=tile_r, tile_l=tile_l, n_splits=n_splits,
        alpha=alpha, gamma=gamma, focal_label=focal_label,
        vmem_limit_bytes=vmem_limit)

    # Tiny epilogue: cross-lane / cross-split reduction, row masking, dice.
    loss_rows = loss_p.sum(axis=(0, 3))          # (B, Q_pad)
    inter = inter_p.sum(axis=(0, 3))
    psum = psum_p.sum(axis=(0, 3))
    tsum = tsum_p.sum(axis=(0, 3))
    loss_mask = jnp.sum(loss_rows * row_mask) / num_boxes / L
    dice = (1.0 - (2.0 * inter + 1.0) / (psum + tsum + 1.0)) * row_mask
    loss_dice = jnp.sum(dice) / num_boxes
    return {"loss_mask": loss_mask, "loss_dice": loss_dice}


# --------------------------------------------------------------------------
# Pure-JAX reference (sanity check)
# --------------------------------------------------------------------------
def reference_loss(output, feat, targets, indices, num_boxes, *, focal_label=True,
                   alpha=0.25, gamma=2.0, bf16_projection=False):
    output = jnp.asarray(output, jnp.float32)
    feat = jnp.asarray(feat, jnp.float32)
    _, _, H, W = feat.shape
    if bf16_projection:      # mirror the kernel's bf16 projection for a tight check
        output = output.astype(jnp.bfloat16).astype(jnp.float32)
        feat = feat.astype(jnp.bfloat16).astype(jnp.float32)
    src_masks = jnp.concatenate([
        jnp.einsum('qc,chw->qhw', output[i][np.asarray(src)], feat[i],
                   precision=lax.Precision.HIGHEST)
        for i, (src, _) in enumerate(indices)], axis=0)
    gathered = [np.asarray(t["masks"], dtype=np.float32)[np.asarray(tgt)]
                for t, (_, tgt) in zip(targets, indices)]
    tgt_all, _ = concat_and_pad_masks(gathered)
    tgt_all = nearest_resize_np(tgt_all, H, W)

    x = src_masks.reshape(src_masks.shape[0], -1)
    t = jnp.asarray(tgt_all.reshape(tgt_all.shape[0], -1))
    p = jax.nn.sigmoid(x)
    ce = jnp.maximum(x, 0.0) - x * t + jnp.log1p(jnp.exp(-jnp.abs(x)))
    if focal_label:
        p_t = p * t + (1.0 - p) * (1.0 - t)
        loss = ce * (1.0 - p_t) ** gamma
        if alpha >= 0:
            loss = (alpha * t + (1.0 - alpha) * (1.0 - t)) * loss
    else:
        loss = ce
    loss_mask = loss.sum() / num_boxes / x.shape[1]
    numer = 2.0 * (p * t).sum(axis=1)
    denom = p.sum(axis=1) + t.sum(axis=1)
    loss_dice = (1.0 - (numer + 1.0) / (denom + 1.0)).sum() / num_boxes
    return {"loss_mask": loss_mask, "loss_dice": loss_dice}


if __name__ == "__main__":
    # Small deterministic config consistent with the module's forward.
    B, Q, C, H, W = 2, 8, 32, 16, 16
    key = jax.random.PRNGKey(0)
    k1, k2, k3 = jax.random.split(key, 3)
    output = jax.random.normal(k1, (B, Q, C), dtype=jnp.float32) * 0.5
    feat = jax.random.normal(k2, (B, C, H, W), dtype=jnp.float32) * 0.5

    # Hungarian-style matching indices: (src_query_idx, tgt_idx) per image.
    indices = [
        (np.array([0, 3, 5]), np.array([0, 1, 2])),
        (np.array([1, 4]), np.array([1, 0])),
    ]
    mk = jax.random.split(k3, 2)
    targets = [
        {"masks": np.asarray(jax.random.uniform(mk[0], (3, 24, 24)) > 0.5,
                             dtype=np.float32)},
        {"masks": np.asarray(jax.random.uniform(mk[1], (2, 24, 24)) > 0.5,
                             dtype=np.float32)},
    ]
    num_boxes = 5.0

    losses = semantic_mask_loss_forward(output, feat, targets, indices, num_boxes,
                                        focal_label=True)
    loss_mask = float(jax.block_until_ready(losses["loss_mask"]))
    loss_dice = float(jax.block_until_ready(losses["loss_dice"]))

    # (a) tight check vs. a reference that uses the same bf16 projection (isolates
    #     the in-kernel loss math).
    ref16 = reference_loss(output, feat, targets, indices, num_boxes,
                           focal_label=True, bf16_projection=True)
    assert np.allclose(loss_mask, float(ref16["loss_mask"]), rtol=5e-3, atol=5e-3), \
        (loss_mask, float(ref16["loss_mask"]))
    assert np.allclose(loss_dice, float(ref16["loss_dice"]), rtol=5e-3, atol=5e-3), \
        (loss_dice, float(ref16["loss_dice"]))

    # (b) semantics check vs. the full-f32 reference (tolerance covers the
    #     deliberate bf16-projection rounding).
    ref32 = reference_loss(output, feat, targets, indices, num_boxes,
                           focal_label=True, bf16_projection=False)
    assert np.allclose(loss_mask, float(ref32["loss_mask"]), rtol=2e-2, atol=2e-2), \
        (loss_mask, float(ref32["loss_mask"]))
    assert np.allclose(loss_dice, float(ref32["loss_dice"]), rtol=2e-2, atol=2e-2), \
        (loss_dice, float(ref32["loss_dice"]))

    print("KERNEL_OK")
</pallas_src>

<mosaic_0001>
module attributes {stable_mosaic.version = 11 : i64} {
  func.func @kernel(%arg0: i32, %arg1: i32, %arg2: i32, %arg3: i32, %arg4: memref<1x32x32xbf16, #tpu.memory_space<vmem>>, %arg5: memref<1x32x256xbf16, #tpu.memory_space<vmem>>, %arg6: memref<1x32x256xi8, #tpu.memory_space<vmem>>, %arg7: memref<1x256xf32, #tpu.memory_space<vmem>>, %arg8: memref<1x1x32x128xf32, #tpu.memory_space<vmem>>, %arg9: memref<1x1x32x128xf32, #tpu.memory_space<vmem>>, %arg10: memref<1x1x32x128xf32, #tpu.memory_space<vmem>>, %arg11: memref<1x1x32x128xf32, #tpu.memory_space<vmem>>) attributes {dimension_semantics = [#tpu.dimension_semantics<parallel>, #tpu.dimension_semantics<parallel>, #tpu.dimension_semantics<parallel>, #tpu.dimension_semantics<arbitrary>], iteration_bounds = array<i64: 1, 2, 1, 1>, scalar_prefetch = 0 : i64, scratch_operands = 0 : i64, tpu.core_type = #tpu.core_type<tc>, window_params = [{transform_indices = @transform_0, window_bounds = array<i64: 1, 32, 32>}, {transform_indices = @transform_1, window_bounds = array<i64: 1, 32, 256>}, {transform_indices = @transform_2, window_bounds = array<i64: 1, 32, 256>}, {transform_indices = @transform_3, window_bounds = array<i64: 1, 256>}, {transform_indices = @transform_4, window_bounds = array<i64: 1, 1, 32, 128>}, {transform_indices = @transform_5, window_bounds = array<i64: 1, 1, 32, 128>}, {transform_indices = @transform_6, window_bounds = array<i64: 1, 1, 32, 128>}, {transform_indices = @transform_7, window_bounds = array<i64: 1, 1, 32, 128>}]} {
    %c0_i32 = arith.constant 0 : i32
    %0 = arith.cmpi eq, %arg3, %c0_i32 : i32
    %1 = arith.extui %0 : i1 to i32
    %c0_i32_0 = arith.constant 0 : i32
    %2 = arith.cmpi ne, %1, %c0_i32_0 : i32
    scf.if %2 {
      %cst_54 = arith.constant 0.000000e+00 : f32
      %90 = vector.broadcast %cst_54 : f32 to vector<1x1x32x128xf32>
      %c0_55 = arith.constant 0 : index
      %c0_56 = arith.constant 0 : index
      %c0_57 = arith.constant 0 : index
      %c0_58 = arith.constant 0 : index
      %91 = vector.load %arg8[%c0_55, %c0_56, %c0_57, %c0_58] : memref<1x1x32x128xf32, #tpu.memory_space<vmem>>, vector<1x1x32x128xf32>
      tpu.vector_store %arg8[%c0_55, %c0_56, %c0_57, %c0_58], %90 {strides = array<i32>} : memref<1x1x32x128xf32, #tpu.memory_space<vmem>>, vector<1x1x32x128xf32>,
      %cst_59 = arith.constant 0.000000e+00 : f32
      %92 = vector.broadcast %cst_59 : f32 to vector<1x1x32x128xf32>
      %c0_60 = arith.constant 0 : index
      %c0_61 = arith.constant 0 : index
      %c0_62 = arith.constant 0 : index
      %c0_63 = arith.constant 0 : index
      %93 = vector.load %arg9[%c0_60, %c0_61, %c0_62, %c0_63] : memref<1x1x32x128xf32, #tpu.memory_space<vmem>>, vector<1x1x32x128xf32>
      tpu.vector_store %arg9[%c0_60, %c0_61, %c0_62, %c0_63], %92 {strides = array<i32>} : memref<1x1x32x128xf32, #tpu.memory_space<vmem>>, vector<1x1x32x128xf32>,
      %cst_64 = arith.constant 0.000000e+00 : f32
      %94 = vector.broadcast %cst_64 : f32 to vector<1x1x32x128xf32>
      %c0_65 = arith.constant 0 : index
      %c0_66 = arith.constant 0 : index
      %c0_67 = arith.constant 0 : index
      %c0_68 = arith.constant 0 : index
      %95 = vector.load %arg10[%c0_65, %c0_66, %c0_67, %c0_68] : memref<1x1x32x128xf32, #tpu.memory_space<vmem>>, vector<1x1x32x128xf32>
      tpu.vector_store %arg10[%c0_65, %c0_66, %c0_67, %c0_68], %94 {strides = array<i32>} : memref<1x1x32x128xf32, #tpu.memory_space<vmem>>, vector<1x1x32x128xf32>,
      %cst_69 = arith.constant 0.000000e+00 : f32
      %96 = vector.broadcast %cst_69 : f32 to vector<1x1x32x128xf32>
      %c0_70 = arith.constant 0 : index
      %c0_71 = arith.constant 0 : index
      %c0_72 = arith.constant 0 : index
      %c0_73 = arith.constant 0 : index
      %97 = vector.load %arg11[%c0_70, %c0_71, %c0_72, %c0_73] : memref<1x1x32x128xf32, #tpu.memory_space<vmem>>, vector<1x1x32x128xf32>
      tpu.vector_store %arg11[%c0_70, %c0_71, %c0_72, %c0_73], %96 {strides = array<i32>} : memref<1x1x32x128xf32, #tpu.memory_space<vmem>>, vector<1x1x32x128xf32>,
    } else {
    }
    %c0 = arith.constant 0 : index
    %c0_1 = arith.constant 0 : index
    %c0_2 = arith.constant 0 : index
    %3 = vector.load %arg4[%c0, %c0_1, %c0_2] : memref<1x32x32xbf16, #tpu.memory_space<vmem>>, vector<1x32x32xbf16>
    %4 = vector.shape_cast %3 : vector<1x32x32xbf16> to vector<32x32xbf16>
    %c0_3 = arith.constant 0 : index
    %c0_4 = arith.constant 0 : index
    %c0_5 = arith.constant 0 : index
    %5 = vector.load %arg5[%c0_3, %c0_4, %c0_5] : memref<1x32x256xbf16, #tpu.memory_space<vmem>>, vector<1x32x256xbf16>
    %6 = vector.shape_cast %5 : vector<1x32x256xbf16> to vector<32x256xbf16>
    %cst = arith.constant dense<0.000000e+00> : vector<32x256xf32>
    %7 = tpu.matmul %4, %6, %cst {dimension_numbers = #tpu.dot_dimension_numbers<[1], [0], [0], [1], [0, 0, 1, 1], [], []>} : vector<32x32xbf16>, vector<32x256xbf16>, vector<32x256xf32> -> vector<32x256xf32>
    %c0_6 = arith.constant 0 : index
    %c0_7 = arith.constant 0 : index
    %c0_8 = arith.constant 0 : index
    %8 = vector.load %arg6[%c0_6, %c0_7, %c0_8] : memref<1x32x256xi8, #tpu.memory_space<vmem>>, vector<1x32x256xi8>
    %9 = vector.shape_cast %8 : vector<1x32x256xi8> to vector<32x256xi8>
    %10 = arith.sitofp %9 : vector<32x256xi8> to vector<32x256xf32>
    %c0_9 = arith.constant 0 : index
    %c0_10 = arith.constant 0 : index
    %11 = vector.load %arg7[%c0_9, %c0_10] : memref<1x256xf32, #tpu.memory_space<vmem>>, vector<1x256xf32>
    %12 = math.absf %7 : vector<32x256xf32>
    %cst_11 = arith.constant 0.000000e+00 : f32
    %13 = vector.broadcast %cst_11 : f32 to vector<32x256xf32>
    %14 = arith.subf %13, %12 : vector<32x256xf32>
    %15 = math.exp %14 : vector<32x256xf32>
    %cst_12 = arith.constant 0.000000e+00 : f32
    %16 = vector.broadcast %cst_12 : f32 to vector<32x256xf32>
    %17 = arith.maximumf %7, %16 : vector<32x256xf32>
    %18 = arith.mulf %7, %10 : vector<32x256xf32>
    %19 = arith.subf %17, %18 : vector<32x256xf32>
    %20 = math.log1p %15 : vector<32x256xf32>
    %21 = arith.addf %19, %20 : vector<32x256xf32>
    %cst_13 = arith.constant 1.000000e+00 : f32
    %22 = vector.broadcast %cst_13 : f32 to vector<32x256xf32>
    %23 = arith.addf %22, %15 : vector<32x256xf32>
    %24 = tpu.reciprocal %23 {approx = true} : vector<32x256xf32> -> vector<32x256xf32>
    %cst_14 = arith.constant 0.000000e+00 : f32
    %25 = vector.broadcast %cst_14 : f32 to vector<32x256xf32>
    %26 = arith.cmpf oge, %7, %25 : vector<32x256xf32>
    %cst_15 = arith.constant 1.000000e+00 : f32
    %27 = vector.broadcast %cst_15 : f32 to vector<32x256xf32>
    %28 = arith.select %26, %27, %15 : vector<32x256xi1>, vector<32x256xf32>
    %29 = arith.mulf %28, %24 : vector<32x256xf32>
    %30 = arith.mulf %29, %10 : vector<32x256xf32>
    %cst_16 = arith.constant 1.000000e+00 : f32
    %31 = vector.broadcast %cst_16 : f32 to vector<32x256xf32>
    %32 = arith.subf %31, %29 : vector<32x256xf32>
    %cst_17 = arith.constant 1.000000e+00 : f32
    %33 = vector.broadcast %cst_17 : f32 to vector<32x256xf32>
    %34 = arith.subf %33, %10 : vector<32x256xf32>
    %35 = arith.mulf %32, %34 : vector<32x256xf32>
    %36 = arith.addf %30, %35 : vector<32x256xf32>
    %cst_18 = arith.constant 1.000000e+00 : f32
    %37 = vector.broadcast %cst_18 : f32 to vector<32x256xf32>
    %38 = arith.subf %37, %36 : vector<32x256xf32>
    %39 = arith.mulf %38, %38 : vector<32x256xf32>
    %40 = arith.mulf %21, %39 : vector<32x256xf32>
    %cst_19 = arith.constant 2.500000e-01 : f32
    %41 = vector.broadcast %cst_19 : f32 to vector<32x256xf32>
    %42 = arith.mulf %41, %10 : vector<32x256xf32>
    %cst_20 = arith.constant 1.000000e+00 : f32
    %43 = vector.broadcast %cst_20 : f32 to vector<32x256xf32>
    %44 = arith.subf %43, %10 : vector<32x256xf32>
    %cst_21 = arith.constant 7.500000e-01 : f32
    %45 = vector.broadcast %cst_21 : f32 to vector<32x256xf32>
    %46 = arith.mulf %45, %44 : vector<32x256xf32>
    %47 = arith.addf %42, %46 : vector<32x256xf32>
    %48 = arith.mulf %47, %40 : vector<32x256xf32>
    %49 = vector.broadcast %11 : vector<1x256xf32> to vector<32x256xf32>
    %50 = arith.mulf %48, %49 : vector<32x256xf32>
    %51 = vector.broadcast %11 : vector<1x256xf32> to vector<32x256xf32>
    %52 = arith.mulf %29, %51 : vector<32x256xf32>
    %53 = arith.mulf %29, %10 : vector<32x256xf32>
    %c0_22 = arith.constant 0 : index
    %c0_23 = arith.constant 0 : index
    %c0_24 = arith.constant 0 : index
    %c0_25 = arith.constant 0 : index
    %54 = vector.load %arg8[%c0_22, %c0_23, %c0_24, %c0_25] : memref<1x1x32x128xf32, #tpu.memory_space<vmem>>, vector<1x1x32x128xf32>
    %55 = vector.shape_cast %54 : vector<1x1x32x128xf32> to vector<32x128xf32>
    %56 = vector.extract_strided_slice %50 {offsets = [0, 0], sizes = [32, 128], strides = [1, 1]} : vector<32x256xf32> to vector<32x128xf32>
    %57 = vector.extract_strided_slice %50 {offsets = [0, 128], sizes = [32, 128], strides = [1, 1]} : vector<32x256xf32> to vector<32x128xf32>
    %58 = arith.addf %56, %57 : vector<32x128xf32>
    %59 = arith.addf %55, %58 : vector<32x128xf32>
    %c0_26 = arith.constant 0 : index
    %c0_27 = arith.constant 0 : index
    %c0_28 = arith.constant 0 : index
    %c0_29 = arith.constant 0 : index
    %60 = vector.load %arg8[%c0_26, %c0_27, %c0_28, %c0_29] : memref<1x1x32x128xf32, #tpu.memory_space<vmem>>, vector<1x1x32x128xf32>
    %61 = vector.shape_cast %60 : vector<1x1x32x128xf32> to vector<32x128xf32>
    %62 = vector.shape_cast %59 : vector<32x128xf32> to vector<1x1x32x128xf32>
    tpu.vector_store %arg8[%c0_26, %c0_27, %c0_28, %c0_29], %62 {strides = array<i32>} : memref<1x1x32x128xf32, #tpu.memory_space<vmem>>, vector<1x1x32x128xf32>,
    %c0_30 = arith.constant 0 : index
    %c0_31 = arith.constant 0 : index
    %c0_32 = arith.constant 0 : index
    %c0_33 = arith.constant 0 : index
    %63 = vector.load %arg9[%c0_30, %c0_31, %c0_32, %c0_33] : memref<1x1x32x128xf32, #tpu.memory_space<vmem>>, vector<1x1x32x128xf32>
    %64 = vector.shape_cast %63 : vector<1x1x32x128xf32> to vector<32x128xf32>
    %65 = vector.extract_strided_slice %53 {offsets = [0, 0], sizes = [32, 128], strides = [1, 1]} : vector<32x256xf32> to vector<32x128xf32>
    %66 = vector.extract_strided_slice %53 {offsets = [0, 128], sizes = [32, 128], strides = [1, 1]} : vector<32x256xf32> to vector<32x128xf32>
    %67 = arith.addf %65, %66 : vector<32x128xf32>
    %68 = arith.addf %64, %67 : vector<32x128xf32>
    %c0_34 = arith.constant 0 : index
    %c0_35 = arith.constant 0 : index
    %c0_36 = arith.constant 0 : index
    %c0_37 = arith.constant 0 : index
    %69 = vector.load %arg9[%c0_34, %c0_35, %c0_36, %c0_37] : memref<1x1x32x128xf32, #tpu.memory_space<vmem>>, vector<1x1x32x128xf32>
    %70 = vector.shape_cast %69 : vector<1x1x32x128xf32> to vector<32x128xf32>
    %71 = vector.shape_cast %68 : vector<32x128xf32> to vector<1x1x32x128xf32>
    tpu.vector_store %arg9[%c0_34, %c0_35, %c0_36, %c0_37], %71 {strides = array<i32>} : memref<1x1x32x128xf32, #tpu.memory_space<vmem>>, vector<1x1x32x128xf32>,
    %c0_38 = arith.constant 0 : index
    %c0_39 = arith.constant 0 : index
    %c0_40 = arith.constant 0 : index
    %c0_41 = arith.constant 0 : index
    %72 = vector.load %arg10[%c0_38, %c0_39, %c0_40, %c0_41] : memref<1x1x32x128xf32, #tpu.memory_space<vmem>>, vector<1x1x32x128xf32>
    %73 = vector.shape_cast %72 : vector<1x1x32x128xf32> to vector<32x128xf32>
    %74 = vector.extract_strided_slice %52 {offsets = [0, 0], sizes = [32, 128], strides = [1, 1]} : vector<32x256xf32> to vector<32x128xf32>
    %75 = vector.extract_strided_slice %52 {offsets = [0, 128], sizes = [32, 128], strides = [1, 1]} : vector<32x256xf32> to vector<32x128xf32>
    %76 = arith.addf %74, %75 : vector<32x128xf32>
    %77 = arith.addf %73, %76 : vector<32x128xf32>
    %c0_42 = arith.constant 0 : index
    %c0_43 = arith.constant 0 : index
    %c0_44 = arith.constant 0 : index
    %c0_45 = arith.constant 0 : index
    %78 = vector.load %arg10[%c0_42, %c0_43, %c0_44, %c0_45] : memref<1x1x32x128xf32, #tpu.memory_space<vmem>>, vector<1x1x32x128xf32>
    %79 = vector.shape_cast %78 : vector<1x1x32x128xf32> to vector<32x128xf32>
    %80 = vector.shape_cast %77 : vector<32x128xf32> to vector<1x1x32x128xf32>
    tpu.vector_store %arg10[%c0_42, %c0_43, %c0_44, %c0_45], %80 {strides = array<i32>} : memref<1x1x32x128xf32, #tpu.memory_space<vmem>>, vector<1x1x32x128xf32>,
    %c0_46 = arith.constant 0 : index
    %c0_47 = arith.constant 0 : index
    %c0_48 = arith.constant 0 : index
    %c0_49 = arith.constant 0 : index
    %81 = vector.load %arg11[%c0_46, %c0_47, %c0_48, %c0_49] : memref<1x1x32x128xf32, #tpu.memory_space<vmem>>, vector<1x1x32x128xf32>
    %82 = vector.shape_cast %81 : vector<1x1x32x128xf32> to vector<32x128xf32>
    %83 = vector.extract_strided_slice %10 {offsets = [0, 0], sizes = [32, 128], strides = [1, 1]} : vector<32x256xf32> to vector<32x128xf32>
    %84 = vector.extract_strided_slice %10 {offsets = [0, 128], sizes = [32, 128], strides = [1, 1]} : vector<32x256xf32> to vector<32x128xf32>
    %85 = arith.addf %83, %84 : vector<32x128xf32>
    %86 = arith.addf %82, %85 : vector<32x128xf32>
    %c0_50 = arith.constant 0 : index
    %c0_51 = arith.constant 0 : index
    %c0_52 = arith.constant 0 : index
    %c0_53 = arith.constant 0 : index
    %87 = vector.load %arg11[%c0_50, %c0_51, %c0_52, %c0_53] : memref<1x1x32x128xf32, #tpu.memory_space<vmem>>, vector<1x1x32x128xf32>
    %88 = vector.shape_cast %87 : vector<1x1x32x128xf32> to vector<32x128xf32>
    %89 = vector.shape_cast %86 : vector<32x128xf32> to vector<1x1x32x128xf32>
    tpu.vector_store %arg11[%c0_50, %c0_51, %c0_52, %c0_53], %89 {strides = array<i32>} : memref<1x1x32x128xf32, #tpu.memory_space<vmem>>, vector<1x1x32x128xf32>,
    return
  }
  func.func @transform_0(%arg0: i32, %arg1: i32, %arg2: i32, %arg3: i32) -> (i32, i32, i32) {
    %c0_i32 = arith.constant 0 : i32
    %c0_i32_0 = arith.constant 0 : i32
    return %arg1, %arg2, %c0_i32 : i32, i32, i32
  }
  func.func @transform_1(%arg0: i32, %arg1: i32, %arg2: i32, %arg3: i32) -> (i32, i32, i32) {
    %c1_i32 = arith.constant 1 : i32
    %0 = arith.muli %arg0, %c1_i32 : i32
    %1 = arith.addi %0, %arg3 : i32
    %c0_i32 = arith.constant 0 : i32
    %c0_i32_0 = arith.constant 0 : i32
    return %arg1, %c0_i32, %1 : i32, i32, i32
  }
  func.func @transform_2(%arg0: i32, %arg1: i32, %arg2: i32, %arg3: i32) -> (i32, i32, i32) {
    %c1_i32 = arith.constant 1 : i32
    %0 = arith.muli %arg0, %c1_i32 : i32
    %1 = arith.addi %0, %arg3 : i32
    %c0_i32 = arith.constant 0 : i32
    return %arg1, %arg2, %1 : i32, i32, i32
  }
  func.func @transform_3(%arg0: i32, %arg1: i32, %arg2: i32, %arg3: i32) -> (i32, i32) {
    %c1_i32 = arith.constant 1 : i32
    %0 = arith.muli %arg0, %c1_i32 : i32
    %1 = arith.addi %0, %arg3 : i32
    %c0_i32 = arith.constant 0 : i32
    %c0_i32_0 = arith.constant 0 : i32
    return %c0_i32, %1 : i32, i32
  }
  func.func @transform_4(%arg0: i32, %arg1: i32, %arg2: i32, %arg3: i32) -> (i32, i32, i32, i32) {
    %c0_i32 = arith.constant 0 : i32
    %c0_i32_0 = arith.constant 0 : i32
    return %arg0, %arg1, %arg2, %c0_i32 : i32, i32, i32, i32
  }
  func.func @transform_5(%arg0: i32, %arg1: i32, %arg2: i32, %arg3: i32) -> (i32, i32, i32, i32) {
    %c0_i32 = arith.constant 0 : i32
    %c0_i32_0 = arith.constant 0 : i32
    return %arg0, %arg1, %arg2, %c0_i32 : i32, i32, i32, i32
  }
  func.func @transform_6(%arg0: i32, %arg1: i32, %arg2: i32, %arg3: i32) -> (i32, i32, i32, i32) {
    %c0_i32 = arith.constant 0 : i32
    %c0_i32_0 = arith.constant 0 : i32
    return %arg0, %arg1, %arg2, %c0_i32 : i32, i32, i32, i32
  }
  func.func @transform_7(%arg0: i32, %arg1: i32, %arg2: i32, %arg3: i32) -> (i32, i32, i32, i32) {
    %c0_i32 = arith.constant 0 : i32
    %c0_i32_0 = arith.constant 0 : i32
    return %arg0, %arg1, %arg2, %c0_i32 : i32, i32, i32, i32
  }
}

</mosaic_0001>

<bundles_post_ra>
// kernel: tpu_custom_call.1
= control target key start
LH: loop header
LB: loop body
LE: loop exit
PB: predicated region body
PF: predicated region fallthrough
CT: control target
= control target key end

     0   :  { %s2593_s0 = inlined_call_operand.hbm [shape: bf16[2,32,32], index: 0, kind: input, shape index: {}]   ;;  %s2594_s1 = inlined_call_operand.hbm [shape: bf16[2,32,256], index: 1, kind: input, shape index: {}]   ;;  %s2595_s2 = inlined_call_operand.hbm [shape: s8[2,32,256], index: 2, kind: input, shape index: {}]   ;;  %s2596_s3 = inlined_call_operand.vmem [shape: f32[1,256], index: 3, kind: input, shape index: {}]   ;;  %s2597_s4 = inlined_call_operand.hbm [shape: f32[1,2,32,128], index: 4, kind: output, shape index: {0}]   ;;  %s2598_s5 = inlined_call_operand.hbm [shape: f32[1,2,32,128], index: 5, kind: output, shape index: {1}]   ;;  %s2599_s6 = inlined_call_operand.hbm [shape: f32[1,2,32,128], index: 6, kind: output, shape index: {2}]   ;;  %s2600_s7 = inlined_call_operand.hbm [shape: f32[1,2,32,128], index: 7, kind: output, shape index: {3}]  }
   0x1   :  { %2615 = sst [smem:[#allocation24_spill]] %s2593_s0 }
   0x2   :  { %2616 = sst [smem:[#allocation25_spill]] %s2594_s1 }
   0x3   :  { %13 = vsyncpa [#allocation3], 0 }
   0x4   :  { %15 = vsyncpa [#allocation3 + $0x1], 0 }
   0x5   :  { %16 = vsyncpa [#allocation6], 0 }
   0x6   :  { %18 = vsyncpa [#allocation6 + $0x1], 0 }
   0x7   :  { %19 = vsyncpa [#allocation4], 0 }
   0x8   :  { %21 = vsyncpa [#allocation4 + $0x1], 0 }
   0x9   :  { %22 = vsyncpa [#allocation10], 0 }
   0xa   :  { %24 = vsyncpa [#allocation10 + $0x1], 0 }
   0xb   :  { %25 = vsyncpa [#allocation13], 0 }
   0xc   :  { %27 = vsyncpa [#allocation13 + $0x1], 0  ;;  %s1891_s24 = smov 0   ;;  %s1893_s25 = smov 0  }
   0xd   :  { %s1895_s26 = smov 0   ;;  %s1897_s27 = smov 0  }
   0xe   :  { %s1899_s28 = smov 0   ;;  %s1901_s29 = smov 0  }
   0xf LB: > { %2617 = sst [smem:[#allocation19_spill]] %s1823_s26  ;;  %s1922_s30 = sadd.s32 4294967295, %s1835_s29   ;;  %s1835_s29 = sphi %s1901_s29, %s33_s29   ;;  %s1831_s28 = sphi %s1899_s28, %s2668_s28   ;;  %s1827_s27 = sphi %s1897_s27, %s2667_s27   ;;  %s1823_s26 = sphi %s1895_s26, %s2663_s26   ;;  %s1819_s25 = sphi %s1893_s25, %s2666_s25   ;;  %s1815_s24 = sphi %s1891_s24, %s2665_s24  }
  0x10   : > { %2618 = sst [smem:[#allocation20_spill]] %s1835_s29  ;;  %s2601_s8 = sadd.s32 4294967294, %s1835_s29  }
  0x11   : > { %s55_s9 = sadd.s32 1, %s1831_s28  ;;  %s68_s10 = sadd.s32 1, %s1823_s26 }
  0x12   : > { %p57_p0 = scmp.ge.s32.totalorder %s55_s9, 2  ;;  %p75_p1 = scmp.ne.s32.totalorder %s1823_s26, %s1819_s25 }
  0x13   : > { %p76_p2 = scmp.eq.s32.totalorder %s1835_s29, 0  ;;  %p81_p3 = scmp.ne.s32.totalorder %s1819_s25, %s1815_s24 }
  0x14   : > { %s2670_s9 = smov (%p57_p0, %s55_s9), 0  ;;  %p82_p5 = scmp.eq.s32.totalorder %s1922_s30, 0 }
  0x15   : > { %2619 = sst [smem:[#allocation21_spill]] %s2670_s9  ;;  %p1934_p4 = por %p76_p2, %p75_p1 }
  0x16   : > { %s63_s12 = ssub.s32 %s1831_s28, %s2670_s9  ;;  %p199_p6 = scmp.eq.s32.totalorder %s1922_s30, 1 }
  0x17   : > { %p66_p7 = scmp.eq.s32.totalorder %s63_s12, 0  ;;  %p1942_p8 = por %p82_p5, %p81_p3 }
  0x18   : > { %p1946_p9 = por %p199_p6, %p75_p1  ;;  %p205_p10 = scmp.eq.s32.totalorder %s2601_s8, 1 }
  0x19   : > { %s2621_s13 = scalar_select %p1942_p8, 1, 0 }
  0x1a   : > { %s2622_s14 = scalar_select %p1946_p9, 1, 0 }
  0x1b   : > { %s1953_s15 = scalar_select %p66_p7, %s1823_s26, %s68_s10  }
  0x1c   : > { %p1955_p11 = por %p205_p10, %p81_p3  ;;  %p1453_p13 = scmp.lt.s32.totalorder %s1835_s29, 2 }
  0x1d   : > { %2623 = sst [smem:[#allocation22_spill]] %s1953_s15  ;;  %s1962_s17 = sand.u32 1, %s1823_s26  }
  0x1e   : > { %s2624_s16 = scalar_select %p1955_p11, 1, 0 }
  0x1f   : > { %s348_s18 = sand.u32 1, %s1835_s29   ;;  %s1369_s19 = sshll.u32 %s1962_s17, 5 }
  0x20   : > { %2625 = sst [smem:[#allocation23_spill]] %s2624_s16  ;;  %p1968_p0 = pnand %p1453_p13, %p1934_p4 }
  0x21   : > { %s1406_s21 = sshll.u32 %s1831_s28, 9  ;;  %s2627_s1 = sld [smem:[#allocation25_spill]] }
  0x22   : > { %s2626_s20 = scalar_select %p1968_p0, 1, 0 }
  0x23   : > { %s352_s12 = scalar_lea.vmem [#allocation5], %s1369_s19  ;;  %s1980_s11 = scalar_lea.sflag [#allocation6], %s348_s18 }
  0x24   : > { %s362_s8 = sshll.u32 %s352_s12, 4  ;;  %p1986_p2 = pneg %p1968_p0  ;;  %s1978_s8 = int_to_ptr.vmem [resolvable:$true] %s362_s8 }
  0x27   : > { %s1976_s10 = scalar_lea.hbm %s2627_s1, %s1406_s21  ;;  %s1572_s19 = scalar_lea.hbm %s2627_s1, 1024 }
  0x28   : > { %s1567_s9 = scalar_lea.hbm %s1976_s10, 512  ;;  %p1573_p5 = scmp.lt.u32.totalorder %s1976_s10, %s2627_s1 }
  0x29   : > { %p1568_p1 = scmp.ne.s32.totalorder %s1976_s10, %s1567_s9  ;;  %p1574_p6 = scmp.lt.u32.totalorder %s1572_s19, %s1567_s9 }
  0x2a   : > { %p1576_p10 = scmp.lt.u32.totalorder %s1567_s9, %s1976_s10 }
  0x2b   : > { %p1570_p3 = pnand %p1986_p2, %p1568_p1  ;;  %p1575_p7 = por %p1574_p6, %p1573_p5 }
  0x2d   : > { %p1571_p4 = pneg %p1570_p3  ;;  %p1577_p13 = por %p1576_p10, %p1575_p7 }
  0x2f   : > { %p1578_p12 = pnand %p1577_p13, %p1571_p4 }
  0x31   : > { %1581 = shalt.err (!%p1578_p12)
}
  0x32   : > { %s1582_s18 = scalar_lea.vmem %s1978_s8, 512  ;;  %s1837_s21 = smov [#allocation5]  }
  0x33   : > { %p1583_p1 = scmp.ne.s32.totalorder %s1978_s8, %s1582_s18  ;;  %s1587_s22 = sshll.u32 %s1837_s21, 4  ;;  %s1588_s22 = int_to_ptr.vmem [resolvable:$false] %s1587_s22 }
  0x34   : > { %s1589_s23 = scalar_lea.vmem %s1588_s22, 1024  ;;  %p1590_p9 = scmp.lt.s32.totalorder %s1978_s8, %s1588_s22 }
  0x35   : > { %p1585_p3 = pnand %p1583_p1, %p1986_p2  ;;  %p1591_p8 = scmp.lt.s32.totalorder %s1589_s23, %s1582_s18 }
  0x37   : > { %p1586_p11 = pneg %p1585_p3  ;;  %p1592_p5 = por %p1591_p8, %p1590_p9 }
  0x39   : > { %p1593_p6 = pnand %p1592_p5, %p1586_p11 }
  0x3b   : > { %1596 = shalt.err (!%p1593_p6)
}
  0x3c   : > { %s1838_s9 = smov 128   ;;  %s1839_s19 = smov 8  }
  0x3d   : > { %1436 = dma.hbm_to_vmem [thread:$0]  (!%p1968_p0), %s1976_s10, 512, %s1978_s8, %s1980_s11, %s1838_s9, %s1838_s9, %s1839_s19  }
  0x3e   : > { %p1375_p12 = scmp.ge.s32.totalorder %s1835_s29, 1  ;;  %p394_p8 = scmp.lt.s32.totalorder %s1835_s29, 3 }
  0x3f   : > { %s2609_s18 = sshll.u32 %s1962_s17, 4  ;;  %s2608_s21 = sshll.u32 %s1831_s28, 8 }
  0x40   : > { %p2012_p9 = pnand %p1375_p12, %p394_p8  ;;  %s2630_s0 = sld [smem:[#allocation24_spill]] }
  0x41   : > { %s329_s8 = scalar_lea.vmem [#allocation2], %s2609_s18  ;;  %s326_s9 = scalar_lea.sflag [#allocation3], %s1962_s17 }
  0x42   : > { %s2629_s12 = scalar_select %p2012_p9, 1, 0 }
  0x43   : > { %s338_s10 = sshll.u32 %s329_s8, 4  ;;  %s2027_s10 = int_to_ptr.vmem [resolvable:$true] %s338_s10 }
  0x46   : > { %s2023_s1 = scalar_lea.hbm %s2630_s0, %s2608_s21  ;;  %s1602_s22 = scalar_lea.hbm %s2630_s0, 512 }
  0x47   : > { %s1597_s19 = scalar_lea.hbm %s2023_s1, 256  ;;  %p1603_p10 = scmp.lt.u32.totalorder %s2023_s1, %s2630_s0 }
  0x48   : > { %p1598_p11 = scmp.ne.s32.totalorder %s2023_s1, %s1597_s19  ;;  %p1604_p13 = scmp.lt.u32.totalorder %s1602_s22, %s1597_s19 }
  0x49   : > { %p1606_p3 = scmp.lt.u32.totalorder %s1597_s19, %s2023_s1 }
  0x4a   : > { %p1600_p4 = pnand %p1598_p11, %p1986_p2  ;;  %p1605_p1 = por %p1604_p13, %p1603_p10 }
  0x4c   : > { %p1601_p7 = pneg %p1600_p4  ;;  %p1607_p5 = por %p1606_p3, %p1605_p1 }
  0x4e   : > { %p1608_p6 = pnand %p1607_p5, %p1601_p7 }
  0x50   : > { %1611 = shalt.err (!%p1608_p6)
}
  0x51   : > { %s1612_s8 = scalar_lea.vmem %s2027_s10, 256  ;;  %s1840_s26 = smov [#allocation2]  }
  0x52   : > { %p1613_p12 = scmp.ne.s32.totalorder %s2027_s10, %s1612_s8  ;;  %s1617_s29 = sshll.u32 %s1840_s26, 4  ;;  %s1618_s29 = int_to_ptr.vmem [resolvable:$false] %s1617_s29 }
  0x53   : > { %s1619_s21 = scalar_lea.vmem %s1618_s29, 512  ;;  %p1620_p4 = scmp.lt.s32.totalorder %s2027_s10, %s1618_s29 }
  0x54   : > { %p1615_p8 = pnand %p1613_p12, %p1986_p2  ;;  %p1621_p9 = scmp.lt.s32.totalorder %s1619_s21, %s1612_s8 }
  0x56   : > { %p1616_p11 = pneg %p1615_p8  ;;  %p1622_p10 = por %p1621_p9, %p1620_p4 }
  0x58   : > { %p1623_p13 = pnand %p1622_p10, %p1616_p11 }
  0x5a   : > { %1626 = shalt.err (!%p1623_p13)
}
  0x5b   : > { %s1841_s19 = smov 64   ;;  %s1842_s22 = smov 4  }
  0x5c   : > { %1433 = dma.hbm_to_vmem [thread:$0]  (!%p1968_p0), %s2023_s1, 256, %s2027_s10, %s326_s9, %s1841_s19, %s1841_s19, %s1842_s22  }
  0x5d   : > { %s2631_s23 = sshll.u32 %s1831_s28, 8  ;;  %s2632_s29 = sshll.u32 %s1962_s17, 4 }
  0x5e   : > { %s2058_s8 = scalar_lea.hbm %s2595_s2, %s2631_s23  ;;  %s376_s21 = scalar_lea.vmem [#allocation7], %s2632_s29 }
  0x5f   : > { %s389_s0 = sshll.u32 %s376_s21, 4  ;;  %s1627_s16 = scalar_lea.hbm %s2058_s8, 256  ;;  %s390_s0 = int_to_ptr.vmem [resolvable:$true] %s389_s0 }
  0x60   : > { %p1628_p9 = scmp.ne.s32.totalorder %s2058_s8, %s1627_s16  ;;  %s1632_s9 = scalar_lea.hbm %s2595_s2, 512 }
  0x61   : > { %p1633_p3 = scmp.lt.u32.totalorder %s2058_s8, %s2595_s2  ;;  %p1634_p5 = scmp.lt.u32.totalorder %s1632_s9, %s1627_s16 }
  0x62   : > { %p1630_p7 = pnand %p1628_p9, %p1986_p2  ;;  %p1636_p12 = scmp.lt.u32.totalorder %s1627_s16, %s2058_s8 }
  0x63   : > { %p1635_p6 = por %p1634_p5, %p1633_p3 }
  0x64   : > { %p1631_p1 = pneg %p1630_p7 }
  0x65   : > { %p1637_p8 = por %p1636_p12, %p1635_p6 }
  0x67   : > { %p1638_p11 = pnand %p1637_p8, %p1631_p1 }
  0x69   : > { %1641 = shalt.err (!%p1638_p11)
}
  0x6a   : > { %s1642_s17 = scalar_lea.vmem %s390_s0, 256  ;;  %s1843_s22 = smov [#allocation7]  }
  0x6b   : > { %p1643_p4 = scmp.ne.s32.totalorder %s390_s0, %s1642_s17  ;;  %s1647_s23 = sshll.u32 %s1843_s22, 4  ;;  %s1648_s23 = int_to_ptr.vmem [resolvable:$false] %s1647_s23 }
  0x6c   : > { %s1649_s26 = scalar_lea.vmem %s1648_s23, 512  ;;  %p1650_p9 = scmp.lt.s32.totalorder %s390_s0, %s1648_s23 }
  0x6d   : > { %p1645_p10 = pnand %p1643_p4, %p1986_p2  ;;  %p1651_p7 = scmp.lt.s32.totalorder %s1649_s26, %s1642_s17 }
  0x6f   : > { %p1646_p13 = pneg %p1645_p10  ;;  %p1652_p0 = por %p1651_p7, %p1650_p9 }
  0x71   : > { %p1653_p3 = pnand %p1652_p0, %p1646_p13 }
  0x73   : > { %1656 = shalt.err (!%p1653_p3)
}
  0x74   : > { %p2633_p5 = scmp.ne.s32.totalorder %s2626_s20, 0  ;;  %p2634_p1 = scmp.ne.s32.totalorder %s2629_s12, 0 }
  0x75   : > { %s2083_s15 = sand.u32 (!%p2634_p1), 1, %s1819_s25   ;;  %p2635_p0 = scmp.ne.s32.totalorder (!%p2634_p1), %s2621_s13, 0 }
  0x76   : > { %1439 = dma.hbm_to_vmem [thread:$0]  (!%p2633_p5), %s2058_s8, 256, %s390_s0, %s1980_s11  }
  0x77   : > { %398 = sbr.rel (%p2634_p1) target bundleno = 495 (0x1ef), region = 36  ;;  %s1376_s16 = sshll.u32 (!%p2634_p1), %s2083_s15, 4 }
  0x78   : > { %s401_s29 = scalar_lea.sflag (!%p2634_p1), [#allocation3], %s2083_s15  ;;  %s404_s21 = scalar_lea.vmem (!%p2634_p1), [#allocation2], %s1376_s16 }
  0x7e   : > { %1794 = dma.done.wait (%p2635_p0), %s401_s29, 256  }
  0x7f   : > { %1796 = vsyncadd (%p2635_p0), %s401_s29, 4294967040  ;;  %s409_s0 = sand.u32 1, %s1922_s30   ;;  %s2095_s20 = sshll.u32 %s2083_s15, 5 }
  0x80   : > { %s410_s11 = scalar_lea.sflag [#allocation6], %s409_s0  ;;  %s413_s12 = scalar_lea.vmem [#allocation5], %s2095_s20 }
  0x81   : > { %1798 = dma.done.wait (%p2635_p0), %s410_s11, 768  }
  0x82   : > { %1800 = vsyncadd (%p2635_p0), %s410_s11, 4294966528  ;;  %v1844_v0 = vmov 0   ;;  %v1511_v1 = vld [vmem:[%s413_s12 + $0x4] ss:$8 sps:$4 sm:$0xff]   ;;  %v1513_v2 = vld [vmem:[%s413_s12] ss:$8 sps:$4 sm:$0xff]  }
  0x83   : > { %597 = vmatprep.mubr.bf16.mxu0 %v1844_v0  ;;  %607 = vmatprep.mubr.bf16.mxu1 %v1844_v0  ;;  %v1514_v3 = vld [vmem:[%s413_s12 + $0x14] ss:$8 sps:$4 sm:$0xff]   ;;  %v1516_v4 = vld [vmem:[%s413_s12 + $0x10] ss:$8 sps:$4 sm:$0xff]   ;;  %vm558_vm0 = vcmask 261120   ;;  %s422_s13 = scalar_lea.vmem [#allocation7], %s1376_s16 }
  0x84   : > { %565 = vmatprep.subr.bf16.mxu0 %v1511_v1  ;;  %1412 = vmatprep.subr.bf16.mxu1 %v1511_v1  ;;  %v1517_v5 = vld [vmem:[%s404_s21] sm:$0xff]   ;;  %v1518_v6 = vld [vmem:[%s404_s21 + $0x8] sm:$0xff]   ;;  %s482_s8 = scalar_lea.vmem [#allocation12], %s2095_s20  ;;  %s2132_s1 = sshll.u32 %s1827_s27, 9 }
  0x85   : > { %566 = vmatpush1.bf16.msra.mxu0 %v1513_v2  ;;  %1414 = vmatpush1.bf16.msra.mxu1 %v1513_v2  ;;  %v618_v7 = vld [vmem:[%s422_s13] sm:$0xff]  ;;  %v619_v8 = vld [vmem:[%s422_s13 + $0x8] sm:$0xff]  ;;  %s2138_s18 = scalar_lea.hbm %s2600_s7, %s2132_s1  ;;  %s1093_s19 = sshll.u32 %s482_s8, 4  ;;  %s2140_s19 = int_to_ptr.vmem [resolvable:$true] %s1093_s19 }
  0x86   : > { %567 = vmatprep.subr.bf16.mxu0 %v1514_v3  ;;  %1413 = vmatprep.subr.bf16.mxu1 %v1514_v3  ;;  %v622_v9 = vunpack.c.1.s8 %v618_v7  ;;  %v623_v10 = vunpack.c.1.s8 %v619_v8  ;;  %v620_v14 = vunpack.c.0.s8 %v618_v7  ;;  %v624_v15 = vunpack.c.2.s8 %v618_v7  ;;  %s1016_s17 = scalar_lea.sflag [#allocation13], %s2083_s15  ;;  %s1657_s22 = scalar_lea.vmem %s2140_s19, 512 }
  0x87   : > { %v621_v16 = vunpack.c.0.s8 %v619_v8  ;;  %v625_v17 = vunpack.c.2.s8 %v619_v8  ;;  %v626_v18 = vunpack.c.3.s8 %v618_v7  ;;  %v627_v19 = vunpack.c.3.s8 %v619_v8  ;;  %p1658_p2 = scmp.ne.s32.totalorder %s2140_s19, %s1657_s22  ;;  %p2636_p6 = scmp.ne.s32.totalorder %s2622_s14, 0 }
  0x88   : > { %v2106_v11 = vcvt.s32.f32 %v622_v9  ;;  %v2108_v12 = vcvt.s32.f32 %v623_v10  ;;  %v2113_v20 = vcvt.s32.f32 %v620_v14  ;;  %v2115_v21 = vcvt.s32.f32 %v624_v15  ;;  %s1845_s27 = smov [#allocation12]  }
  0x89   : > { %568 = vmatpush1.bf16.msra.mxu0 %v1516_v4  ;;  %1415 = vmatpush1.bf16.msra.mxu1 %v1516_v4  ;;  %v2117_v22 = vcvt.s32.f32 %v621_v16  ;;  %v2119_v23 = vcvt.s32.f32 %v625_v17  ;;  %v2125_v26 = vcvt.s32.f32 %v626_v18  ;;  %v2127_v27 = vcvt.s32.f32 %v627_v19  ;;  %p1659_p12 = pnand %p1658_p2, %p2636_p6  ;;  %s1661_s23 = sshll.u32 %s1845_s27, 4  ;;  %s1662_s23 = int_to_ptr.vmem [resolvable:$false] %s1661_s23 }
  0x8a   : > { %v989_v13 = vadd.f32 %v2108_v12, %v2106_v11  ;;  %s1663_s26 = scalar_lea.vmem %s1662_s23, 1024  ;;  %p1664_p11 = scmp.lt.s32.totalorder %s2140_s19, %s1662_s23 }
  0x8b   : > { %v988_v24 = vadd.f32 %v2117_v22, %v2113_v20  ;;  %v990_v25 = vadd.f32 %v2119_v23, %v2115_v21  ;;  %v991_v28 = vadd.f32 %v2127_v27, %v2125_v26  ;;  %p1660_p8 = pneg %p1659_p12  ;;  %p1665_p4 = scmp.lt.s32.totalorder %s1663_s26, %s1657_s22 }
  0x8c   : > { %1389 = vmatmul.mubr.msk.bf16.vlgmr.msra.gmra.mrb[0].mxu0 %vm558_vm0, %v1517_v5  ;;  %1390 = vmatmul.mubr.msk.bf16.vlgmr.msra.gmra.mrb[0].mxu1 %vm558_vm0, %v1518_v6  ;;  %997 = vst [vmem:[%s482_s8 + $0x8] sm:$0xff] %v989_v13 }
  0x8d   : > { %999 = vst [vmem:[%s482_s8 + $0x18] sm:$0xff] %v991_v28  ;;  %996 = vst [vmem:[%s482_s8] sm:$0xff] %v988_v24  ;;  %p1666_p10 = por %p1665_p4, %p1664_p11 }
  0x8e   : > { %998 = vst [vmem:[%s482_s8 + $0x10] sm:$0xff] %v990_v25 }
  0x8f   : > { %p1667_p13 = pnand %p1666_p10, %p1660_p8 }
  0x91   : > { %1670 = shalt.err (!%p1667_p13)
}
  0x92   : > { %s1671_s16 = scalar_lea.hbm %s2138_s18, 512  ;;  %s1675_s11 = scalar_lea.hbm %s2600_s7, 1024 }
  0x93   : > { %p1672_p9 = scmp.ne.s32.totalorder %s2138_s18, %s1671_s16  ;;  %p1676_p5 = scmp.lt.u32.totalorder %s2138_s18, %s2600_s7 }
  0x94   : > { %p1677_p1 = scmp.lt.u32.totalorder %s1675_s11, %s1671_s16  ;;  %p1679_p2 = scmp.lt.u32.totalorder %s1671_s16, %s2138_s18 }
  0x95   : > { %p1673_p7 = pnand %p1672_p9, %p2636_p6 }
  0x96   : > { %p1678_p0 = por %p1677_p1, %p1676_p5 }
  0x97   : > { %p1674_p3 = pneg %p1673_p7 }
  0x98   : > { %p1680_p12 = por %p1679_p2, %p1678_p0 }
  0x9a   : > { %p1681_p8 = pnand %p1680_p12, %p1674_p3 }
  0x9c   : > { %1684 = shalt.err (!%p1681_p8)
}
  0x9d   : > { %s1846_s8 = smov 128   ;;  %s1847_s10 = smov 8   ;;  %v910_v29 = vlaneseq  ;;  %v829_v47 = vsub.f32 1.0, %v2113_v20  ;;  %v877_v54 = vmul.f32 0.25, %v2113_v20  ;;  %v833_v55 = vsub.f32 1.0, %v2115_v21 }
  0x9e   : > { %1425 = dma.vmem_to_hbm [thread:$0]  (%p2636_p6), %s2140_s19, 512, %s2138_s18, %s1016_s17, %s1846_s8, %s1846_s8, %s1847_s10   ;;  %v2614_v56 = vsub.f32 1.0, %v2117_v22  ;;  %v881_v60 = vmul.f32 0.25, %v2115_v21  ;;  %v2613_v62 = vsub.f32 1.0, %v2119_v23  ;;  %v878_v1 = vmul.f32 0.25, %v2117_v22 }
  0x9f   : > { %v911_v35 = vshrl.u32 %v910_v29, 7  ;;  %v885_v57 = vmul.f32 0.75, %v829_v47  ;;  %v889_v61 = vmul.f32 0.75, %v833_v55  ;;  %v636_v0 = vld [vmem:[%s2596_s3] sm:$0x3]  ;;  %v2612_v2 = vsub.f32 1.0, %v2106_v11  ;;  %s2459_s16 = scalar_lea.hbm %s2598_s5, %s2132_s1  ;;  %s2469_s11 = scalar_lea.hbm %s2599_s6, %s2132_s1 }
  0xa0   : > { %v886_v4 = vmul.f32 0.75, %v2614_v56  ;;  %v882_v5 = vmul.f32 0.25, %v2119_v23  ;;  %v890_v8 = vmul.f32 0.75, %v2613_v62  ;;  %v879_v9 = vmul.f32 0.25, %v2106_v11  ;;  %s2360_s19 = scalar_lea.vmem [#allocation9], %s2095_s20  ;;  %s2365_s17 = scalar_lea.vmem [#allocation11], %s2095_s20 }
  0xa1   : > { %v912_v48 = vsub.s32 0, %v911_v35  ;;  %v916_v50 = vsub.s32 1, %v911_v35  ;;  %v887_v10 = vmul.f32 0.75, %v2612_v2  ;;  %v2220_v17 = vadd.f32 %v885_v57, %v877_v54  ;;  %s2405_s22 = scalar_lea.vmem [#allocation8], %s2095_s20  ;;  %s1053_s20 = sshll.u32 %s2360_s19, 4  ;;  %s2461_s20 = int_to_ptr.vmem [resolvable:$true] %s1053_s20 }
  0xa2   : > { %v2229_v35 = vadd.f32 %v886_v4, %v878_v1  ;;  %s1073_s27 = sshll.u32 %s2365_s17, 4  ;;  %s2477_s12 = scalar_lea.sflag [#allocation10], %s409_s0  ;;  %s2471_s27 = int_to_ptr.vmem [resolvable:$true] %s1073_s27 }
  0xa3   : > { %v2215_v14 = vrot.slane %v636_v0, %v912_v48  ;;  %v2217_v15 = vrot.slane %v636_v0, %v916_v50  ;;  %s1685_s13 = scalar_lea.vmem %s2461_s20, 512  ;;  %s1848_s9 = smov [#allocation9]  }
  0xa4   : > { %p1686_p11 = scmp.ne.s32.totalorder %s2461_s20, %s1685_s13  ;;  %s1689_s18 = sshll.u32 %s1848_s9, 4  ;;  %s1690_s18 = int_to_ptr.vmem [resolvable:$false] %s1689_s18 }
  0xa5   : > { %s1691_s23 = scalar_lea.vmem %s1690_s18, 1024  ;;  %p1692_p13 = scmp.lt.s32.totalorder %s2461_s20, %s1690_s18 }
  0xa6   : > { %p1687_p4 = pnand %p1686_p11, %p2636_p6  ;;  %p1693_p9 = scmp.lt.s32.totalorder %s1691_s23, %s1685_s13 }
  0xa8   : > { %p1688_p10 = pneg %p1687_p4  ;;  %p1694_p7 = por %p1693_p9, %p1692_p13 }
  0xaa   : > { %p1695_p3 = pnand %p1694_p7, %p1688_p10 }
 0x15f   : > { %v2169_v30 = vpop.f32.mrb[0].mxu0  ;;  %v2171_v31 = vpop.f32.mrb[0].mxu1 }
 0x160   : > { %v637_v32 = vand.u32 2147483647, %v2169_v30  ;;  %v2174_v33 = vpop.f32.mrb[1].mxu0  ;;  %v2176_v34 = vpop.f32.mrb[1].mxu1  ;;  %v641_v36 = vand.u32 2147483647, %v2171_v31  ;;  %v677_v24 = vmul.f32 %v2113_v20, %v2169_v30  ;;  %v681_v28 = vmul.f32 %v2115_v21, %v2171_v31 }
 0x161   : > { %v2179_v37 = vpop.f32.mrb[2].mxu0  ;;  %v2181_v38 = vpop.f32.mrb[2].mxu1  ;;  %v638_v40 = vand.u32 2147483647, %v2174_v33  ;;  %v642_v46 = vand.u32 2147483647, %v2176_v34  ;;  %v678_v50 = vmul.f32 %v2117_v22, %v2174_v33 }
 0x162   : > { %v645_v39 = vsub.f32 0.0, %v637_v32  ;;  %v2184_v41 = vpop.f32.mrb[3].mxu0  ;;  %v2186_v42 = vpop.f32.mrb[3].mxu1  ;;  %v649_v43 = vsub.f32 0.0, %v641_v36  ;;  %v639_v53 = vand.u32 2147483647, %v2179_v37  ;;  %v2227_v32 = vadd.f32 %v889_v61, %v881_v60 }
 0x163   : > { %v646_v45 = vsub.f32 0.0, %v638_v40  ;;  %v650_v52 = vsub.f32 0.0, %v642_v46  ;;  %v643_v63 = vand.u32 2147483647, %v2181_v38  ;;  %v640_v3 = vand.u32 2147483647, %v2184_v41 }
 0x164   : > { %v653_v44 = vmul.f32 1.442695, %v645_v39  ;;  %v661_v49 = vmul.f32 1.442695, %v649_v43  ;;  %v647_v59 = vsub.f32 0.0, %v639_v53  ;;  %v669_v16 = vmax.f32 %v2169_v30, 0.0 }
 0x165   : > { %v655_v51 = vmul.f32 1.442695, %v646_v45  ;;  %v663_v58 = vmul.f32 1.442695, %v650_v52  ;;  %v651_v7 = vsub.f32 0.0, %v643_v63  ;;  %v648_v13 = vsub.f32 0.0, %v640_v3 }
 0x166   : > { %1519 = vpow2.f32 %v653_v44  ;;  %v657_v6 = vmul.f32 1.442695, %v647_v59  ;;  %v673_v25 = vmax.f32 %v2171_v31, 0.0  ;;  %v2231_v36 = vadd.f32 %v890_v8, %v882_v5 }
 0x167   : > { %1521 = vpow2.f32 %v661_v49  ;;  %v665_v18 = vmul.f32 1.442695, %v651_v7  ;;  %v659_v19 = vmul.f32 1.442695, %v648_v13  ;;  %v2233_v39 = vadd.f32 %v887_v10, %v879_v9 }
 0x168   : > { %1523 = vpow2.f32 %v655_v51  ;;  %v2237_v45 = vmul.f32 0.25, %v2108_v12  ;;  %vm789_vm1 = vcmp.ge.f32.partialorder %v2169_v30, 0.0  ;;  %v670_v49 = vmax.f32 %v2174_v33, 0.0 }
 0x169   : > { %1525 = vpow2.f32 %v663_v58  ;;  %v2245_v51 = vsub.f32 %v669_v16, %v677_v24  ;;  %v2247_v52 = vsub.f32 %v673_v25, %v681_v28  ;;  %vm793_vm2 = vcmp.ge.f32.partialorder %v2171_v31, 0.0 }
 0x16a   : > { %1527 = vpow2.f32 %v657_v6  ;;  %v674_v57 = vmax.f32 %v2176_v34, 0.0  ;;  %v682_v58 = vmul.f32 %v2119_v23, %v2176_v34  ;;  %v671_v59 = vmax.f32 %v2179_v37, 0.0 }
 0x16b   : > { %1529 = vpow2.f32 %v659_v19  ;;  %v679_v63 = vmul.f32 %v2106_v11, %v2179_v37  ;;  %v2259_v0 = vsub.f32 %v670_v49, %v678_v50  ;;  %vm790_vm3 = vcmp.ge.f32.partialorder %v2174_v33, 0.0 }
 0x16c   : > { %1531 = vpow2.f32 %v665_v18  ;;  %v644_v5 = vand.u32 2147483647, %v2186_v42  ;;  %v2265_v7 = vsub.f32 %v674_v57, %v682_v58  ;;  %vm794_vm4 = vcmp.ge.f32.partialorder %v2176_v34, 0.0 }
 0x16d   : > { %v2270_v13 = vsub.f32 %v671_v59, %v679_v63  ;;  %vm791_vm5 = vcmp.ge.f32.partialorder %v2179_v37, 0.0  ;;  %v2277_v19 = vmul.f32 %v2108_v12, %v2184_v41  ;;  %vm792_vm11 = vcmp.ge.f32.partialorder %v2184_v41, 0.0 }
 0x16e   : > { %vm795_vm13 = vcmp.ge.f32.partialorder %v2181_v38, 0.0  ;;  %vm796_vm14 = vcmp.ge.f32.partialorder %v2186_v42, 0.0 }
 0x170   : > { %v1520_v29 = vpop.eup %1519 }
 0x171   : > { %v1522_v40 = vpop.eup %1521  ;;  %v693_v43 = vadd.f32 1.0, %v1520_v29  ;;  %v696_v60 = vmul.f32 -0.5, %v1520_v29  ;;  %v699_v3 = vand.u32 2147483647, %v1520_v29  ;;  %v797_v28 = vsel %vm789_vm1, 1.0, %v1520_v29 }
 0x172   : > { %v2239_v46 = vpop.eup %1523  ;;  %v729_v48 = vadd.f32 1.0, %v1522_v40  ;;  %v732_v61 = vmul.f32 -0.5, %v1522_v40  ;;  %v735_v6 = vand.u32 2147483647, %v1522_v40 }
 0x173   : > { %1533 = vlog2.f32 %v693_v43  ;;  %v702_v53 = vadd.f32 1.0, %v2239_v46  ;;  %v2251_v54 = vpop.eup %1525  ;;  %v705_v4 = vmul.f32 -0.5, %v2239_v46  ;;  %v697_v9 = vadd.f32 1.0, %v696_v60 }
 0x174   : > { %1535 = vrcp.f32 %v693_v43  ;;  %v738_v1 = vadd.f32 1.0, %v2251_v54  ;;  %v2268_v8 = vpop.eup %1527  ;;  %v733_v10 = vadd.f32 1.0, %v732_v61  ;;  %v741_v16 = vmul.f32 -0.5, %v2251_v54 }
 0x175   : > { %1537 = vlog2.f32 %v729_v48  ;;  %v2279_v24 = vpop.eup %1529  ;;  %vm2281_vm6 = vcmp.lt.f32.partialorder %v699_v3, 0.0004427343  ;;  %v706_v43 = vadd.f32 1.0, %v705_v4  ;;  %vm2291_vm7 = vcmp.lt.f32.partialorder %v735_v6, 0.0004427343 }
 0x176   : > { %1539 = vrcp.f32 %v729_v48  ;;  %v2287_v48 = vsub.f32 0.0, %v644_v5  ;;  %v2289_v49 = vpop.eup %1531  ;;  %v708_v57 = vand.u32 2147483647, %v2239_v46  ;;  %v711_v58 = vadd.f32 1.0, %v2268_v8 }
 0x177   : > { %1541 = vlog2.f32 %v702_v53  ;;  %v698_v60 = vmul.f32 %v1520_v29, %v697_v9  ;;  %v734_v30 = vmul.f32 %v1522_v40, %v733_v10  ;;  %v798_v61 = vsel %vm790_vm3, 1.0, %v2239_v46 }
 0x178   : > { %1543 = vrcp.f32 %v702_v53  ;;  %v801_v53 = vsel %vm793_vm2, 1.0, %v1522_v40  ;;  %v742_v4 = vadd.f32 1.0, %v741_v16  ;;  %v714_v5 = vmul.f32 -0.5, %v2268_v8 }
 0x179   : > { %1545 = vrcp.f32 %v738_v1  ;;  %v720_v31 = vadd.f32 1.0, %v2279_v24  ;;  %v2305_v44 = vmul.f32 %v2239_v46, %v706_v43  ;;  %v744_v29 = vand.u32 2147483647, %v2251_v54 }
 0x17a   : > { %1547 = vlog2.f32 %v738_v1  ;;  %v802_v33 = vsel %vm794_vm4, 1.0, %v2251_v54  ;;  %vm2311_vm8 = vcmp.lt.f32.partialorder %v708_v57, 0.0004427343  ;;  %v717_v10 = vand.u32 2147483647, %v2268_v8 }
 0x17b   : > { %1549 = vrcp.f32 %v711_v58  ;;  %v2319_v46 = vsel %vm791_vm5, 1.0, %v2268_v8  ;;  %v2324_v43 = vadd.f32 1.0, %v2289_v49  ;;  %vm2341_vm9 = vcmp.lt.f32.partialorder %v744_v29, 0.0004427343 }
 0x17c   : > { %1551 = vlog2.f32 %v711_v58  ;;  %vm2353_vm10 = vcmp.lt.f32.partialorder %v717_v10, 0.0004427343 }
 0x17d   : > { %v1534_v59 = vpop.eup %1533  ;;  %1553 = vlog2.f32 %v720_v31 }
 0x17e   : > { %v1536_v63 = vpop.eup %1535  ;;  %v695_v3 = vmul.f32 0.6931472, %v1534_v59  ;;  %1555 = vrcp.f32 %v720_v31 }
 0x17f   : > { %v1538_v6 = vpop.eup %1537  ;;  %v805_v18 = vmul.f32 %v1536_v63, %v797_v28  ;;  %v2327_v63 = vmul.f32 %v2251_v54, %v742_v4  ;;  %1557 = vrcp.f32 %v2324_v43 }
 0x180   : > { %v1540_v40 = vpop.eup %1539  ;;  %v731_v1 = vmul.f32 0.6931472, %v1538_v6  ;;  %v701_v28 = vsel %vm2281_vm6, %v698_v60, %v695_v3  ;;  %v715_v6 = vadd.f32 1.0, %v714_v5 }
 0x181   : > { %v1542_v16 = vpop.eup %1541  ;;  %v821_v34 = vsub.f32 1.0, %v805_v18  ;;  %v809_v59 = vmul.f32 %v1540_v40, %v801_v53  ;;  %v813_v37 = vmul.f32 %v805_v18, %v2113_v20  ;;  %v765_v58 = vadd.f32 %v701_v28, %v2245_v51 }
 0x182   : > { %v1544_v57 = vpop.eup %1543  ;;  %v928_v60 = vmul.f32 %v2215_v14, %v805_v18  ;;  %v737_v53 = vsel %vm2291_vm7, %v734_v30, %v731_v1  ;;  %v704_v4 = vmul.f32 0.6931472, %v1542_v16 }
 0x183   : > { %v837_v2 = vmul.f32 %v829_v47, %v821_v34  ;;  %v806_v62 = vmul.f32 %v1544_v57, %v798_v61  ;;  %v1546_v25 = vpop.eup %1545  ;;  %v825_v3 = vsub.f32 1.0, %v809_v59  ;;  %v817_v56 = vmul.f32 %v809_v59, %v2115_v21 }
 0x184   : > { %v810_v18 = vmul.f32 %v1546_v25, %v802_v33  ;;  %v1548_v50 = vpop.eup %1547  ;;  %v2645_v61 = vsub.f32 1.0, %v2117_v22  ;;  %v932_v21 = vmul.f32 %v2215_v14, %v809_v59  ;;  %v710_v33 = vsel %vm2311_vm8, %v2305_v44, %v704_v4 }
 0x185   : > { %v845_v54 = vadd.f32 %v837_v2, %v813_v37  ;;  %v814_v5 = vmul.f32 %v806_v62, %v2117_v22  ;;  %v822_v40 = vsub.f32 1.0, %v806_v62  ;;  %v841_v20 = vmul.f32 %v833_v55, %v825_v3  ;;  %v1550_v22 = vpop.eup %1549 }
 0x186   : > { %v929_v47 = vmul.f32 %v2217_v15, %v806_v62  ;;  %v769_v2 = vadd.f32 %v737_v53, %v2247_v52  ;;  %v818_v62 = vmul.f32 %v810_v18, %v2119_v23  ;;  %v826_v57 = vsub.f32 1.0, %v810_v18  ;;  %v1552_v59 = vpop.eup %1551 }
 0x187   : > { %v853_v30 = vsub.f32 1.0, %v845_v54  ;;  %v838_v31 = vmul.f32 %v2645_v61, %v822_v40  ;;  %v956_v1 = vadd.f32 %v814_v5, %v813_v37  ;;  %v849_v16 = vadd.f32 %v841_v20, %v817_v56  ;;  %v1554_v10 = vpop.eup %1553 }
 0x188   : > { %v972_v55 = vadd.f32 %v929_v47, %v928_v60  ;;  %v933_v37 = vmul.f32 %v2217_v15, %v810_v18  ;;  %v740_v44 = vmul.f32 0.6931472, %v1548_v50  ;;  %v958_v9 = vadd.f32 %v818_v62, %v817_v56 }
 0x189   : > { %v861_v29 = vmul.f32 %v853_v30, %v853_v30  ;;  %v846_v28 = vadd.f32 %v838_v31, %v814_v5  ;;  %v857_v52 = vsub.f32 1.0, %v849_v16  ;;  %964 = vst [vmem:[%s2360_s19] sm:$0xff] %v956_v1  ;;  %v766_v3 = vadd.f32 %v710_v33, %v2259_v0  ;;  %v1556_v5 = vpop.eup %1555 }
 0x18a   : > { %980 = vst [vmem:[%s2365_s17] sm:$0xff] %v972_v55  ;;  %v2648_v54 = vsub.f32 1.0, %v2119_v23  ;;  %v807_v56 = vmul.f32 %v1550_v22, %v2319_v46  ;;  %v713_v50 = vmul.f32 0.6931472, %v1552_v59  ;;  %v746_v0 = vsel %vm2341_vm9, %v2327_v63, %v740_v44  ;;  %966 = vst [vmem:[%s2360_s19 + $0x10] sm:$0xff] %v958_v9 }
 0x18b   : > { %v869_v25 = vmul.f32 %v861_v29, %v765_v58  ;;  %v854_v60 = vsub.f32 1.0, %v846_v28  ;;  %v865_v53 = vmul.f32 %v857_v52, %v857_v52  ;;  %v974_v58 = vadd.f32 %v933_v37, %v932_v21 }
 0x18c   : > { %v842_v4 = vmul.f32 %v2648_v54, %v826_v57  ;;  %v716_v23 = vmul.f32 %v2268_v8, %v715_v6  ;;  %v823_v61 = vsub.f32 1.0, %v807_v56  ;;  %v815_v16 = vmul.f32 %v807_v56, %v2106_v11 }
 0x18d   : > { %v901_v40 = vmul.f32 %v2220_v17, %v869_v25  ;;  %v862_v20 = vmul.f32 %v854_v60, %v854_v60  ;;  %v873_v47 = vmul.f32 %v865_v53, %v769_v2  ;;  %982 = vst [vmem:[%s2365_s17 + $0x10] sm:$0xff] %v974_v58  ;;  %v723_v17 = vmul.f32 -0.5, %v2279_v24 }
 0x18e   : > { %v850_v18 = vadd.f32 %v842_v4, %v818_v62  ;;  %v2649_v63 = vsub.f32 1.0, %v2106_v11  ;;  %v770_v8 = vadd.f32 %v746_v0, %v2265_v7  ;;  %v719_v21 = vsel %vm2353_vm10, %v716_v23, %v713_v50 }
 0x18f   : > { %v870_v30 = vmul.f32 %v862_v20, %v766_v3  ;;  %v920_v31 = vmul.f32 %v2215_v14, %v901_v40  ;;  %v905_v46 = vmul.f32 %v2227_v32, %v873_v47  ;;  %v667_v55 = vmul.f32 1.442695, %v2287_v48 }
 0x190   : > { %v858_v1 = vsub.f32 1.0, %v850_v18  ;;  %v839_v51 = vmul.f32 %v2649_v63, %v823_v61  ;;  %v726_v32 = vand.u32 2147483647, %v2279_v24  ;;  %v930_v11 = vmul.f32 %v2215_v14, %v807_v56 }
 0x191   : > { %v902_v2 = vmul.f32 %v2229_v35, %v870_v30  ;;  %v800_v35 = vsel %vm792_vm11, 1.0, %v2279_v24  ;;  %v724_v28 = vadd.f32 1.0, %v723_v17  ;;  %v924_v34 = vmul.f32 %v2215_v14, %v905_v46 }
 0x192   : > { %v866_v6 = vmul.f32 %v858_v1, %v858_v1  ;;  %v847_v29 = vadd.f32 %v839_v51, %v815_v16  ;;  %v808_v7 = vmul.f32 %v1556_v5, %v800_v35  ;;  %v767_v48 = vadd.f32 %v719_v21, %v2270_v13  ;;  %v1558_v5 = vpop.eup %1557 }
 0x193   : > { %v921_v62 = vmul.f32 %v2217_v15, %v902_v2  ;;  %v722_v44 = vmul.f32 0.6931472, %v1554_v10  ;;  %1559 = vpow2.f32 %v667_v55  ;;  %v2650_v53 = vsub.f32 1.0, %v2108_v12 }
 0x194   : > { %v874_v33 = vmul.f32 %v866_v6, %v770_v8  ;;  %v855_v52 = vsub.f32 1.0, %v847_v29  ;;  %v816_v37 = vmul.f32 %v808_v7, %v2108_v12  ;;  %v824_v59 = vsub.f32 1.0, %v808_v7 }
 0x195   : > { %v940_v22 = vadd.f32 %v921_v62, %v920_v31  ;;  %v931_v25 = vmul.f32 %v2217_v15, %v808_v7  ;;  %v725_v13 = vmul.f32 %v2279_v24, %v724_v28  ;;  %vm727_vm12 = vcmp.lt.f32.partialorder %v726_v32, 0.0004427343 }
 0x196   : > { %v906_v57 = vmul.f32 %v2231_v36, %v874_v33  ;;  %v863_v60 = vmul.f32 %v855_v52, %v855_v52  ;;  %v840_v3 = vmul.f32 %v2650_v53, %v824_v59  ;;  %v957_v54 = vadd.f32 %v816_v37, %v815_v16 }
 0x197   : > { %v973_v4 = vadd.f32 %v931_v25, %v930_v11  ;;  %948 = vst [vmem:[%s2405_s22] sm:$0xff] %v940_v22  ;;  %v2651_v10 = vmov %v2650_v53  ;;  %v728_v56 = vsel %vm727_vm12, %v725_v13, %v722_v44  ;;  %v803_v47 = vsel %vm795_vm13, 1.0, %v2289_v49 }
 0x198   : > { %v925_v9 = vmul.f32 %v2217_v15, %v906_v57  ;;  %v871_v36 = vmul.f32 %v863_v60, %v767_v48  ;;  %v888_v58 = vmul.f32 0.75, %v2651_v10  ;;  %v848_v20 = vadd.f32 %v840_v3, %v816_v37  ;;  %965 = vst [vmem:[%s2360_s19 + $0x8] sm:$0xff] %v957_v54 }
 0x199   : > { %v2652_v18 = vmax.f32 %v2184_v41, 0.0  ;;  %981 = vst [vmem:[%s2365_s17 + $0x8] sm:$0xff] %v973_v4  ;;  %v811_v24 = vmul.f32 %v1558_v5, %v803_v47  ;;  %1561 = vlog2.f32 %v2324_v43  ;;  %v835_v41 = vsub.f32 1.0, %v2125_v26 }
 0x19a   : > { %v942_v40 = vadd.f32 %v925_v9, %v924_v34  ;;  %v856_v30 = vsub.f32 1.0, %v848_v20  ;;  %v903_v12 = vmul.f32 %v2233_v39, %v871_v36  ;;  %v896_v61 = vadd.f32 %v888_v58, %v2237_v45 }
 0x19b   : > { %v688_v50 = vsub.f32 %v2652_v18, %v2277_v19  ;;  %v827_v17 = vsub.f32 1.0, %v811_v24  ;;  %v750_v39 = vmul.f32 -0.5, %v2289_v49  ;;  %v819_v45 = vmul.f32 %v811_v24, %v2125_v26 }
 0x19c   : > { %950 = vst [vmem:[%s2405_s22 + $0x10] sm:$0xff] %v942_v40  ;;  %v864_v23 = vmul.f32 %v856_v30, %v856_v30  ;;  %v922_v19 = vmul.f32 %v2215_v14, %v903_v12  ;;  %v753_v21 = vand.u32 2147483647, %v2289_v49  ;;  %v675_v62 = vmax.f32 %v2181_v38, 0.0 }
 0x19d   : > { %v768_v0 = vadd.f32 %v728_v56, %v688_v50  ;;  %v1560_v1 = vpop.eup %1559  ;;  %v843_v63 = vmul.f32 %v835_v41, %v827_v17  ;;  %v751_v6 = vadd.f32 1.0, %v750_v39  ;;  %v683_v29 = vmul.f32 %v2125_v26, %v2181_v38 }
 0x19e   : > { %v756_v2 = vadd.f32 1.0, %v1560_v1  ;;  %v759_v35 = vmul.f32 -0.5, %v1560_v1  ;;  %vm2434_vm15 = vcmp.lt.f32.partialorder %v753_v21, 0.0004427343  ;;  %v883_v7 = vmul.f32 0.25, %v2125_v26 }
 0x19f   : > { %v872_v31 = vmul.f32 %v864_v23, %v768_v0  ;;  %v851_v8 = vadd.f32 %v843_v63, %v819_v45  ;;  %v752_v33 = vmul.f32 %v2289_v49, %v751_v6  ;;  %v891_v34 = vmul.f32 0.75, %v835_v41 }
 0x1a0   : > { %1563 = vrcp.f32 %v756_v2  ;;  %v804_v22 = vsel %vm796_vm14, 1.0, %v1560_v1  ;;  %v934_v52 = vmul.f32 %v2215_v14, %v811_v24  ;;  %v836_v49 = vsub.f32 1.0, %v2127_v27 }
 0x1a1   : > { %v904_v46 = vmul.f32 %v896_v61, %v872_v31  ;;  %1565 = vlog2.f32 %v756_v2  ;;  %v859_v32 = vsub.f32 1.0, %v851_v8  ;;  %v691_v37 = vsub.f32 %v675_v62, %v683_v29 }
 0x1a2   : > { %v760_v25 = vadd.f32 1.0, %v759_v35  ;;  %v762_v60 = vand.u32 2147483647, %v1560_v1  ;;  %v899_v3 = vadd.f32 %v891_v34, %v883_v7  ;;  %v676_v54 = vmax.f32 %v2186_v42, 0.0 }
 0x1a3   : > { %v923_v16 = vmul.f32 %v2217_v15, %v904_v46  ;;  %v1562_v43 = vpop.eup %1561  ;;  %v867_v59 = vmul.f32 %v859_v32, %v859_v32  ;;  %v684_v36 = vmul.f32 %v2127_v27, %v2186_v42  ;;  %v884_v20 = vmul.f32 0.25, %v2127_v27 }
 0x1a4   : > { %v749_v55 = vmul.f32 0.6931472, %v1562_v43  ;;  %v761_v40 = vmul.f32 %v1560_v1, %v760_v25  ;;  %v892_v56 = vmul.f32 0.75, %v836_v49  ;;  %vm2451_vm0 = vcmp.lt.f32.partialorder %v762_v60, 0.0004427343 }
 0x1a5   : > { %v941_v51 = vadd.f32 %v923_v16, %v922_v19 }
 0x1a6   : > { %v755_v38 = vsel %vm2434_vm15, %v752_v33, %v749_v55 }
 0x1a7   : > { %949 = vst [vmem:[%s2405_s22 + $0x8] sm:$0xff] %v941_v51  ;;  %v771_v53 = vadd.f32 %v755_v38, %v691_v37 }
 0x1a9   : > { %v875_v5 = vmul.f32 %v867_v59, %v771_v53 }
 0x1aa   : > { %v1564_v11 = vpop.eup %1563 }
 0x1ab   : > { %v1566_v48 = vpop.eup %1565  ;;  %v812_v57 = vmul.f32 %v1564_v11, %v804_v22 }
 0x1ac   : > { %v758_v4 = vmul.f32 0.6931472, %v1566_v48 }
 0x1ad   : > { %v820_v44 = vmul.f32 %v812_v57, %v2127_v27  ;;  %v828_v26 = vsub.f32 1.0, %v812_v57  ;;  %v935_v9 = vmul.f32 %v2217_v15, %v812_v57  ;;  %v692_v27 = vsub.f32 %v676_v54, %v684_v36 }
 0x1ae   : > { %v764_v42 = vsel %vm2451_vm0, %v761_v40, %v758_v4 }
 0x1af   : > { %v844_v13 = vmul.f32 %v836_v49, %v828_v26  ;;  %v959_v10 = vadd.f32 %v820_v44, %v819_v45  ;;  %v975_v58 = vadd.f32 %v935_v9, %v934_v52 }
 0x1b1   : > { %v852_v18 = vadd.f32 %v844_v13, %v820_v44  ;;  %967 = vst [vmem:[%s2360_s19 + $0x18] sm:$0xff] %v959_v10  ;;  %983 = vst [vmem:[%s2365_s17 + $0x18] sm:$0xff] %v975_v58 }
 0x1b3   : > { %v860_v50 = vsub.f32 1.0, %v852_v18 }
 0x1b4   : > { %1698 = shalt.err (!%p1695_p3)
}
 0x1b5   : > { %s1699_s30 = scalar_lea.hbm %s2459_s16, 512  ;;  %s1703_s17 = scalar_lea.hbm %s2598_s5, 1024 }
 0x1b6   : > { %p1700_p5 = scmp.ne.s32.totalorder %s2459_s16, %s1699_s30  ;;  %p1704_p2 = scmp.lt.u32.totalorder %s2459_s16, %s2598_s5 }
 0x1b7   : > { %p1705_p12 = scmp.lt.u32.totalorder %s1703_s17, %s1699_s30  ;;  %p1707_p11 = scmp.lt.u32.totalorder %s1699_s30, %s2459_s16 }
 0x1b8   : > { %p1701_p1 = pnand %p1700_p5, %p2636_p6 }
 0x1b9   : > { %p1706_p8 = por %p1705_p12, %p1704_p2 }
 0x1ba   : > { %p1702_p0 = pneg %p1701_p1 }
 0x1bb   : > { %p1708_p4 = por %p1707_p11, %p1706_p8 }
 0x1bd   : > { %p1709_p10 = pnand %p1708_p4, %p1702_p0 }
 0x1bf   : > { %1712 = shalt.err (!%p1709_p10)
}
 0x1c0   : > { %1423 = dma.vmem_to_hbm [thread:$0]  (%p2636_p6), %s2461_s20, 512, %s2459_s16, %s2477_s12, %s1846_s8, %s1846_s8, %s1847_s10   ;;  %v907_v30 = vmul.f32 %v899_v3, %v875_v5  ;;  %v772_v24 = vadd.f32 %v764_v42, %v692_v27  ;;  %v868_v12 = vmul.f32 %v860_v50, %v860_v50  ;;  %v900_v0 = vadd.f32 %v892_v56, %v884_v20 }
 0x1c1   : > { %s1713_s21 = scalar_lea.vmem %s2471_s27, 512  ;;  %s1849_s13 = smov [#allocation11]  }
 0x1c2   : > { %p1714_p13 = scmp.ne.s32.totalorder %s2471_s27, %s1713_s21  ;;  %s1717_s9 = sshll.u32 %s1849_s13, 4  ;;  %s1718_s9 = int_to_ptr.vmem [resolvable:$false] %s1717_s9 }
 0x1c3   : > { %s1719_s18 = scalar_lea.vmem %s1718_s9, 1024  ;;  %p1720_p3 = scmp.lt.s32.totalorder %s2471_s27, %s1718_s9 }
 0x1c4   : > { %p1715_p9 = pnand %p1714_p13, %p2636_p6  ;;  %p1721_p5 = scmp.lt.s32.totalorder %s1719_s18, %s1713_s21 }
 0x1c6   : > { %p1716_p7 = pneg %p1715_p9  ;;  %p1722_p1 = por %p1721_p5, %p1720_p3 }
 0x1c8   : > { %p1723_p0 = pnand %p1722_p1, %p1716_p7 }
 0x1ca   : > { %1726 = shalt.err (!%p1723_p0)
}
 0x1cb   : > { %s1727_s20 = scalar_lea.hbm %s2469_s11, 512  ;;  %s1731_s30 = scalar_lea.hbm %s2599_s6, 1024 }
 0x1cc   : > { %p1728_p2 = scmp.ne.s32.totalorder %s2469_s11, %s1727_s20  ;;  %p1732_p11 = scmp.lt.u32.totalorder %s2469_s11, %s2599_s6 }
 0x1cd   : > { %p1733_p4 = scmp.lt.u32.totalorder %s1731_s30, %s1727_s20  ;;  %p1735_p13 = scmp.lt.u32.totalorder %s1727_s20, %s2469_s11 }
 0x1ce   : > { %p1729_p12 = pnand %p1728_p2, %p2636_p6 }
 0x1cf   : > { %p1734_p10 = por %p1733_p4, %p1732_p11 }
 0x1d0   : > { %p1730_p8 = pneg %p1729_p12 }
 0x1d1   : > { %p1736_p9 = por %p1735_p13, %p1734_p10 }
 0x1d3   : > { %p1737_p7 = pnand %p1736_p9, %p1730_p8 }
 0x1d5   : > { %1740 = shalt.err (!%p1737_p7)
}
 0x1d6   : > { %1424 = dma.vmem_to_hbm [thread:$0]  (%p2636_p6), %s2471_s27, 512, %s2469_s11, %s2477_s12, %s1846_s8, %s1846_s8, %s1847_s10   ;;  %v876_v23 = vmul.f32 %v868_v12, %v772_v24  ;;  %v926_v61 = vmul.f32 %v2215_v14, %v907_v30 }
 0x1d7   : > { %s1033_s17 = sshll.u32 %s2405_s22, 4  ;;  %s2536_s21 = scalar_lea.hbm %s2597_s4, %s2132_s1  ;;  %s2538_s17 = int_to_ptr.vmem [resolvable:$true] %s1033_s17 }
 0x1d8   : > { %v908_v31 = vmul.f32 %v900_v0, %v876_v23  ;;  %s1001_s27 = scalar_lea.sflag [#allocation4], %s2083_s15  ;;  %s1741_s11 = scalar_lea.vmem %s2538_s17, 512 }
 0x1d9   : > { %p1742_p3 = scmp.ne.s32.totalorder %s2538_s17, %s1741_s11  ;;  %s1850_s12 = smov [#allocation8]  }
 0x1da   : > { %v927_v1 = vmul.f32 %v2217_v15, %v908_v31  ;;  %s1745_s13 = sshll.u32 %s1850_s12, 4  ;;  %s1746_s13 = int_to_ptr.vmem [resolvable:$false] %s1745_s13 }
 0x1db   : > { %p1743_p5 = pnand %p1742_p3, %p2636_p6  ;;  %s1747_s9 = scalar_lea.vmem %s1746_s13, 1024 }
 0x1dc   : > { %v943_v17 = vadd.f32 %v927_v1, %v926_v61  ;;  %p1748_p0 = scmp.lt.s32.totalorder %s2538_s17, %s1746_s13  ;;  %p1749_p2 = scmp.lt.s32.totalorder %s1747_s9, %s1741_s11 }
 0x1dd   : > { %p1744_p1 = pneg %p1743_p5 }
 0x1de   : > { %951 = vst [vmem:[%s2405_s22 + $0x18] sm:$0xff] %v943_v17  ;;  %p1750_p12 = por %p1749_p2, %p1748_p0 }
 0x1e0   : > { %p1751_p8 = pnand %p1750_p12, %p1744_p1 }
 0x1e2   : > { %1754 = shalt.err (!%p1751_p8)
}
 0x1e3   : > { %s1755_s1 = scalar_lea.hbm %s2536_s21, 512  ;;  %s1759_s20 = scalar_lea.hbm %s2597_s4, 1024 }
 0x1e4   : > { %p1756_p11 = scmp.ne.s32.totalorder %s2536_s21, %s1755_s1  ;;  %p1760_p13 = scmp.lt.u32.totalorder %s2536_s21, %s2597_s4 }
 0x1e5   : > { %p1761_p9 = scmp.lt.u32.totalorder %s1759_s20, %s1755_s1  ;;  %p1763_p3 = scmp.lt.u32.totalorder %s1755_s1, %s2536_s21 }
 0x1e6   : > { %p1757_p4 = pnand %p1756_p11, %p2636_p6 }
 0x1e7   : > { %p1762_p7 = por %p1761_p9, %p1760_p13 }
 0x1e8   : > { %p1758_p10 = pneg %p1757_p4 }
 0x1e9   : > { %p1764_p5 = por %p1763_p3, %p1762_p7 }
 0x1eb   : > { %p1765_p1 = pnand %p1764_p5, %p1758_p10 }
 0x1ed   : > { %1768 = shalt.err (!%p1765_p1)
}
 0x1ee   : > { %1422 = dma.vmem_to_hbm [thread:$0]  (%p2636_p6), %s2538_s17, 512, %s2536_s21, %s1001_s27, %s1846_s8, %s1846_s8, %s1847_s10  }
 0x1ef PF: > { %s2657_s30 = sld [smem:[#allocation23_spill]]  ;;  %s2658_s0 = sld [smem:[#allocation20_spill]] }
 0x1f0   : > { %s1108_s19 = sand.u32 1, %s1815_s24  }
 0x1f1   : > { %s1109_s26 = scalar_lea.sflag [#allocation4], %s1108_s19 }
 0x1f5   : > { %p2659_p0 = scmp.ne.s32.totalorder %s2657_s30, 0  ;;  %p2660_p2 = scmp.ge.s32.totalorder %s2658_s0, 2 }
 0x1f7   : > { %p1441_p12 = pnand %p2660_p2, %p2659_p0 }
 0x1f9   : > { %1802 = dma.done.wait (!%p1441_p12), %s1109_s26, 512  }
 0x1fa   : > { %1804 = vsyncadd (!%p1441_p12), %s1109_s26, 4294966784  ;;  %s2661_s14 = sadd.s32 4294967294, %s2658_s0  }
 0x1fb   : > { %s1117_s29 = sand.u32 1, %s2661_s14  }
 0x1fc   : > { %s1118_s11 = scalar_lea.sflag [#allocation10], %s1117_s29 }
 0x1fd   : > { %1806 = dma.done.wait (!%p1441_p12), %s1118_s11, 1024  }
 0x1fe   : > { %1808 = vsyncadd (!%p1441_p12), %s1118_s11, 4294966272  ;;  %s1136_s15 = scalar_lea.sflag [#allocation13], %s1108_s19 }
 0x1ff   : > { %1810 = dma.done.wait (!%p1441_p12), %s1136_s15, 512  }
 0x200   : > { %1812 = vsyncadd (!%p1441_p12), %s1136_s15, 4294966784  ;;  %s33_s29 = sadd.s32 1, %s2658_s0   ;;  %s2662_s8 = sld [smem:[#allocation19_spill]] }
 0x201   : > { %p30_p6 = scmp.ge.s32.totalorder %s33_s29, 4   ;;  %s2663_s26 = sld [smem:[#allocation22_spill]] }
 0x202   : > { %s2664_s10 = sld [smem:[#allocation21_spill]]  ;;  %s2665_s24 = smov %s1819_s25 }
 0x203   : > { %s2667_s27 = smov %s1831_s28  ;;  %32 = sbr.rel (!%p30_p6) target bundleno = 15 (0xf), region = 161 }
 0x206   : > { %s2666_s25 = smov %s2662_s8 }
 0x208   : > { %s2668_s28 = smov %s2664_s10 }
 0x20a   :  { %1141 = vsyncpa [#allocation3], 1 }
 0x20b   :  { %1143 = vsyncpa [#allocation3 + $0x1], 1 }
 0x20c   :  { %1144 = vsyncpa [#allocation6], 1 }
 0x20d   :  { %1146 = vsyncpa [#allocation6 + $0x1], 1 }
 0x20e   :  { %1147 = vsyncpa [#allocation4], 1 }
 0x20f   :  { %1149 = vsyncpa [#allocation4 + $0x1], 1 }
 0x210   :  { %1150 = vsyncpa [#allocation10], 1 }
 0x211   :  { %1152 = vsyncpa [#allocation10 + $0x1], 1 }
 0x212   :  { %1153 = vsyncpa [#allocation13], 1 }
 0x213   :  { %1155 = vsyncpa [#allocation13 + $0x1], 1 }

</bundles_post_ra>
